<compile_context>
chip_gen: v7x
topology: tpu7x:2x2x1
jax: 0.10.0
libtpu: 0.0.40
codegen_flags: <defaults>
</compile_context>

<pallas_src>
import jax
import jax.numpy as jnp
from jax.experimental import pallas as pl
from jax.experimental.pallas import tpu as pltpu


def _round_up(x, m):
    return ((x + m - 1) // m) * m


def _hier_attn_kernel(src_len_ref, qa_len_ref,
                      ht_pass_ref, ht_word_ref, ht_sent_ref,
                      src_bank_ref, qa_sent_ref, qa_word_ref,
                      c_ref, align_ref, srcv_ref, qav_ref):
    f32 = jnp.float32
    Bt, Tt, D = ht_pass_ref.shape
    S_src = src_bank_ref.shape[1]
    S_q = qa_sent_ref.shape[1]
    SqW = qa_word_ref.shape[1]
    W = SqW // S_q
    S_src_p = srcv_ref.shape[-1]        # padded (128-multiple) widths
    SqW_p = qav_ref.shape[-1]

    ht_pass = ht_pass_ref[...]          # (Bt, Tt, D)  bf16/f32 pre-projected queries
    ht_word = ht_word_ref[...]
    ht_sent = ht_sent_ref[...]
    src_bank = src_bank_ref[...]        # (Bt, S_src, D)
    qa_sent = qa_sent_ref[...]          # (Bt, S_q, D)
    qa_word = qa_word_ref[...]          # (Bt, SqW, D)  sentence-major flattened

    # Raw attention scores, contracting on the feature dim (no bank transpose),
    # f32 accumulation on the MXU.
    src_align = jnp.einsum('btd,bsd->bts', ht_pass, src_bank,
                           preferred_element_type=f32)            # (Bt, Tt, S_src)
    qa_word_align = jnp.einsum('btd,bsd->bts', ht_word, qa_word,
                               preferred_element_type=f32)        # (Bt, Tt, SqW)
    qa_sent_align = jnp.einsum('btd,bsd->bts', ht_sent, qa_sent,
                               preferred_element_type=f32)        # (Bt, Tt, S_q)

    # In-register sentence->word expansion matrix: expand[s, j] = 1 iff j // W == s
    # (no HBM input, no resident VMEM buffer; sentence-major order j = s*W + w).
    j_iota = jax.lax.broadcasted_iota(jnp.int32, (S_q, SqW), 1)
    s_iota = jax.lax.broadcasted_iota(jnp.int32, (S_q, SqW), 0)
    expand = ((j_iota >= s_iota * W) & (j_iota < s_iota * W + W)).astype(f32)
    expand_b = jnp.broadcast_to(expand[None], (Bt, S_q, SqW))     # (Bt, S_q, SqW)

    # Hierarchical scores: each word score scaled by its sentence score.
    qa_sent_exp = jnp.einsum('bts,bsw->btw', qa_sent_align, expand_b,
                             preferred_element_type=f32)          # (Bt, Tt, SqW)
    qa_hier = qa_word_align * qa_sent_exp

    # Masks built in-kernel from the int32 lengths (no f32 mask HBM traffic).
    src_len = src_len_ref[...]                                    # (Bt, 1, 1) int32
    src_pos = jax.lax.broadcasted_iota(jnp.int32, (Bt, Tt, S_src), 2)
    src_mask = src_pos < src_len                                  # (Bt, Tt, S_src)

    qa_len = qa_len_ref[...]                                      # (Bt, 1, S_q) int32
    sent_idx = jax.lax.broadcasted_iota(jnp.int32, (Bt, 1, S_q), 2)
    # word j (= s*W + w) of sentence s is valid iff j < s*W + len[b, s]
    thresh = (sent_idx * W + qa_len).astype(f32)                  # (Bt, 1, S_q)
    thresh_exp = jnp.einsum('bts,bsw->btw', thresh, expand_b,
                            preferred_element_type=f32)           # (Bt, 1, SqW)
    j_pos = jax.lax.broadcasted_iota(jnp.int32, (Bt, Tt, SqW), 2).astype(f32)
    qa_mask = j_pos < thresh_exp                                  # (Bt, Tt, SqW)

    src_masked = jnp.where(src_mask, src_align, -jnp.inf)
    qa_masked = jnp.where(qa_mask, qa_hier, -jnp.inf)

    # Shared-exponential softmaxes. Clamp per-distribution maxima to a finite
    # floor so a fully-masked half contributes exact zeros to the joint softmax
    # (matches the reference) instead of NaN.
    floor = jnp.float32(-1e30)
    m_src = jnp.maximum(jnp.max(src_masked, axis=-1, keepdims=True), floor)
    m_qa = jnp.maximum(jnp.max(qa_masked, axis=-1, keepdims=True), floor)
    e_src = jnp.exp(src_masked - m_src)
    e_qa = jnp.exp(qa_masked - m_qa)
    s_src = jnp.sum(e_src, axis=-1, keepdims=True)
    s_qa = jnp.sum(e_qa, axis=-1, keepdims=True)

    src_vec = e_src * pl.reciprocal(s_src, approx=True)
    qa_vec = e_qa * pl.reciprocal(s_qa, approx=True)

    # Joint softmax over concat([src, qa], -1), reusing e_src / e_qa.
    m_all = jnp.maximum(m_src, m_qa)
    w_src = jnp.exp(m_src - m_all)
    w_qa = jnp.exp(m_qa - m_all)
    inv_all = pl.reciprocal(w_src * s_src + w_qa * s_qa, approx=True)
    a_src = e_src * (w_src * inv_all)                             # (Bt, Tt, S_src)
    a_qa = e_qa * (w_qa * inv_all)                                # (Bt, Tt, SqW)

    # c = align_vectors @ concat([src_bank, qa_word_bank], 1) without
    # materializing the concatenation or any transpose (MXU, f32 accumulate).
    bank_dtype = src_bank.dtype
    c = (jnp.einsum('bts,bsd->btd', a_src.astype(bank_dtype), src_bank,
                    preferred_element_type=f32)
         + jnp.einsum('bts,bsd->btd', a_qa.astype(bank_dtype), qa_word,
                      preferred_element_type=f32))
    c_ref[...] = c.astype(c_ref.dtype)

    # Lane-dense stores: pad each probability slab to a 128-lane multiple and
    # store full blocks / 128-aligned disjoint lane regions (no masked vst.msk,
    # no in-kernel concat relayout).
    def lane_pad(x, width):
        pad = width - x.shape[-1]
        if pad == 0:
            return x
        return jnp.concatenate(
            [x, jnp.zeros(x.shape[:-1] + (pad,), x.dtype)], axis=-1)

    srcv_ref[...] = lane_pad(src_vec, S_src_p).astype(srcv_ref.dtype)
    qav_ref[...] = lane_pad(qa_vec, SqW_p).astype(qav_ref.dtype)
    align_ref[:, :, 0:S_src_p] = lane_pad(a_src, S_src_p).astype(align_ref.dtype)
    align_ref[:, :, S_src_p:S_src_p + SqW_p] = lane_pad(a_qa, SqW_p).astype(align_ref.dtype)


def _vmem_limit_bytes():
    """Per-generation VMEM limit (<= 3/4 of physical, capped at 100 MiB)."""
    try:
        phys = pltpu.get_tpu_info().vmem_capacity_bytes
    except Exception:
        phys = 64 * 1024 * 1024   # conservative (v7x physical VMEM)
    return int(min(phys * 3 // 4, 100 * 1024 * 1024))


def hierarchical_attention(source, src_bank, src_lengths,
                           qa_sent_bank, qa_sent_lengths,
                           qa_word_bank, qa_word_lengths,
                           w_pass, w_qa_word, w_qa_sent,
                           *, compute_dtype=jnp.bfloat16,
                           batch_tile=None, t_tile=None):
    """Pallas implementation of HierarchicalAttention.forward (attn_type='general').

    source:          [B, D] (one-step) or [B, T, D]
    src_bank:        [S_src, B, D]
    src_lengths:     [B] int
    qa_sent_bank:    [S_q, B, D]
    qa_sent_lengths: [B] int (unused by the PyTorch forward — kept for parity)
    qa_word_bank:    [W, B, S_q, D]
    qa_word_lengths: [B, S_q] int
    w_*:             [D, D] nn.Linear weights (out, in), bias-free
    """
    del qa_sent_lengths  # not used by the reference forward

    one_step = source.ndim == 2
    if one_step:
        source = source[:, None, :]

    S_src, B, D = src_bank.shape
    W, _, S_q, _ = qa_word_bank.shape
    T = source.shape[1]
    SqW = S_q * W

    # Lane-dense (128-multiple) output widths; sliced off in the wrapper.
    S_src_p = _round_up(S_src, 128)
    SqW_p = _round_up(SqW, 128)
    Lp = S_src_p + SqW_p

    bank_bytes = jnp.dtype(compute_dtype).itemsize
    vmem_limit = _vmem_limit_bytes()

    # ---- tile selection -----------------------------------------------------
    Tt = int(t_tile) if t_tile is not None else min(T, 8)
    in_row = (3 * Tt * D + (S_src + S_q + SqW) * D) * bank_bytes + (1 + S_q) * 4
    out_row = Tt * (D + Lp + S_src_p + SqW_p) * 4
    per_row = 2 * (in_row + out_row)          # x2 for double-buffering
    if batch_tile is None:
        budget = vmem_limit // 2              # headroom for compiler scratch
        bt = int(max(1, min(budget // per_row, B)))
        if B >= 2:
            # keep >= 2 grid steps so the 'parallel' batch axis can be split
            # across v7x's two TensorCores.
            bt = min(bt, pl.cdiv(B, 2))
    else:
        bt = int(min(batch_tile, B))
    bt = max(1, bt)

    Bp = pl.cdiv(B, bt) * bt
    Tp = pl.cdiv(T, Tt) * Tt
    pad_b, pad_t = Bp - B, Tp - T

    # ---- padding. Padded batch rows get FULL lengths so their softmaxes stay
    # finite (they are sliced off afterwards) — do not change this to zero
    # lengths. Padded query rows are zeros (finite uniform softmax).
    if pad_b or pad_t:
        source = jnp.pad(source, ((0, pad_b), (0, pad_t), (0, 0)))
    if pad_b:
        src_bank = jnp.pad(src_bank, ((0, 0), (0, pad_b), (0, 0)))
        qa_sent_bank = jnp.pad(qa_sent_bank, ((0, 0), (0, pad_b), (0, 0)))
        qa_word_bank = jnp.pad(qa_word_bank, ((0, 0), (0, pad_b), (0, 0), (0, 0)))
        src_lengths = jnp.pad(src_lengths, (0, pad_b), constant_values=S_src)
        qa_word_lengths = jnp.pad(qa_word_lengths, ((0, pad_b), (0, 0)),
                                  constant_values=W)

    # ---- fused query projection: one (Bp*Tp, D) @ (D, 3D) matmul in f32, then
    # cast to the compute dtype (bf16 by default).
    w_fused = jnp.concatenate([w_pass.T, w_qa_word.T, w_qa_sent.T], axis=1)  # (D, 3D)
    ht = (source.reshape(Bp * Tp, D).astype(jnp.float32)
          @ w_fused.astype(jnp.float32)).reshape(Bp, Tp, 3 * D)
    ht = ht.astype(compute_dtype)
    ht_pass = ht[..., 0:D]
    ht_word = ht[..., D:2 * D]
    ht_sent = ht[..., 2 * D:3 * D]

    # ---- batch-major banks (the batched in-kernel contraction needs leading
    # batch dims; the qa_word flatten requires this transpose in PyTorch too).
    # TODO(synk): feed src_bank / qa_sent_bank in their native (S, B, D) layout
    # via (S, Btile, D) blocks once Mosaic dot_general with a mid-position batch
    # dim is verified, to drop these HBM transposes.
    src_bank_b = jnp.transpose(src_bank, (1, 0, 2)).astype(compute_dtype)        # (Bp, S_src, D)
    qa_sent_b = jnp.transpose(qa_sent_bank, (1, 0, 2)).astype(compute_dtype)     # (Bp, S_q, D)
    qa_word_b = jnp.transpose(qa_word_bank, (1, 2, 0, 3)).reshape(Bp, SqW, D)
    qa_word_b = qa_word_b.astype(compute_dtype)                                  # (Bp, SqW, D)

    # ---- compact int32 length inputs (masks are built in-kernel)
    src_len3 = src_lengths.astype(jnp.int32).reshape(Bp, 1, 1)
    qa_len3 = qa_word_lengths.astype(jnp.int32).reshape(Bp, 1, S_q)

    grid = (Bp // bt, Tp // Tt)
    grid_spec = pltpu.PrefetchScalarGridSpec(
        num_scalar_prefetch=0,
        grid=grid,
        in_specs=[
            pl.BlockSpec((bt, 1, 1), lambda i, t: (i, 0, 0)),       # src lengths
            pl.BlockSpec((bt, 1, S_q), lambda i, t: (i, 0, 0)),     # qa word lengths
            pl.BlockSpec((bt, Tt, D), lambda i, t: (i, t, 0)),      # ht_pass
            pl.BlockSpec((bt, Tt, D), lambda i, t: (i, t, 0)),      # ht_word
            pl.BlockSpec((bt, Tt, D), lambda i, t: (i, t, 0)),      # ht_sent
            pl.BlockSpec((bt, S_src, D), lambda i, t: (i, 0, 0)),   # src bank (resident over t)
            pl.BlockSpec((bt, S_q, D), lambda i, t: (i, 0, 0)),     # qa sent bank
            pl.BlockSpec((bt, SqW, D), lambda i, t: (i, 0, 0)),     # qa word bank
        ],
        out_specs=[
            pl.BlockSpec((bt, Tt, D), lambda i, t: (i, t, 0)),      # c
            pl.BlockSpec((bt, Tt, Lp), lambda i, t: (i, t, 0)),     # align (padded)
            pl.BlockSpec((bt, Tt, S_src_p), lambda i, t: (i, t, 0)),  # src_vectors (padded)
            pl.BlockSpec((bt, Tt, SqW_p), lambda i, t: (i, t, 0)),    # qa_hier_vectors (padded)
        ],
    )

    c, align_p, src_p, qa_p = pl.pallas_call(
        _hier_attn_kernel,
        out_shape=(
            jax.ShapeDtypeStruct((Bp, Tp, D), jnp.float32),
            jax.ShapeDtypeStruct((Bp, Tp, Lp), jnp.float32),
            jax.ShapeDtypeStruct((Bp, Tp, S_src_p), jnp.float32),
            jax.ShapeDtypeStruct((Bp, Tp, SqW_p), jnp.float32),
        ),
        grid_spec=grid_spec,
        compiler_params=pltpu.CompilerParams(
            # batch tiles independent (megacore / dual-TC); T inner so banks
            # stay resident across query tiles.
            dimension_semantics=("parallel", "arbitrary"),
            vmem_limit_bytes=vmem_limit,
        ),
    )(src_len3, qa_len3, ht_pass, ht_word, ht_sent,
      src_bank_b, qa_sent_b, qa_word_b)

    # drop batch/T/lane padding
    c = c[:B, :T]
    src_v = src_p[:B, :T, :S_src]
    qa_v = qa_p[:B, :T, :SqW]
    align_v = jnp.concatenate(
        [align_p[:B, :T, :S_src], align_p[:B, :T, S_src_p:S_src_p + SqW]], axis=-1)

    if one_step:
        return c[:, 0], align_v[:, 0], src_v[:, 0], qa_v[:, 0]
    return c, align_v, src_v, qa_v


# Pure-JAX reference mirroring the PyTorch forward. `compute_dtype` applies the
# same precision casts as the kernel wrapper so mixed-precision runs can be
# validated tightly.
def reference_forward(source, src_bank, src_lengths, qa_sent_bank, qa_sent_lengths,
                      qa_word_bank, qa_word_lengths, w_pass, w_qa_word, w_qa_sent,
                      compute_dtype=jnp.float32):
    del qa_sent_lengths
    one_step = source.ndim == 2
    if one_step:
        source = source[:, None, :]
    S_src, B, D = src_bank.shape
    W, _, S_q, _ = qa_word_bank.shape
    T = source.shape[1]
    SqW = S_q * W
    f32 = jnp.float32
    cast = lambda x: x.astype(compute_dtype).astype(f32)

    qa_word_flat = cast(jnp.transpose(qa_word_bank, (1, 2, 0, 3)).reshape(B, SqW, D))
    src_b = cast(jnp.transpose(src_bank, (1, 0, 2)))
    qa_sent_b = cast(jnp.transpose(qa_sent_bank, (1, 0, 2)))

    def score(h_t, h_s, w):
        ht_ = cast(jnp.einsum('btd,ed->bte', h_t.astype(f32), w.astype(f32)))  # x @ W.T
        return jnp.einsum('btd,bsd->bts', ht_, h_s)

    qa_word_align = score(source, qa_word_flat, w_qa_word)
    src_align = score(source, src_b, w_pass)
    qa_sent_align = score(source, qa_sent_b, w_qa_sent)
    qa_hier = (qa_word_align.reshape(B, T, S_q, W)
               * qa_sent_align[..., None]).reshape(B, T, SqW)
    align = jnp.concatenate([src_align, qa_hier], -1)

    qa_mask = (jnp.arange(W)[None, :] <
               qa_word_lengths.reshape(-1)[:, None]).reshape(B, SqW)[:, None, :]
    src_mask = (jnp.arange(S_src)[None, :] < src_lengths[:, None])[:, None, :]
    mask = jnp.concatenate([src_mask, qa_mask], -1)

    align = jnp.where(mask, align, -jnp.inf)
    qa_hier = jnp.where(qa_mask, qa_hier, -jnp.inf)
    src_align = jnp.where(src_mask, src_align, -jnp.inf)

    qa_hier_vec = jax.nn.softmax(qa_hier, -1)
    src_vec = jax.nn.softmax(src_align, -1)
    align_vec = jax.nn.softmax(align, -1)

    mem = jnp.concatenate([src_b, qa_word_flat], 1)
    c = jnp.einsum('btl,bld->btd', cast(align_vec), mem)
    if one_step:
        return c[:, 0], align_vec[:, 0], src_vec[:, 0], qa_hier_vec[:, 0]
    return c, align_vec, src_vec, qa_hier_vec


if __name__ == "__main__":
    B, D = 6, 32
    S_src, S_q, W = 10, 4, 6   # qa_words_max_len == qa_sent_max_len == S_q (module assert)

    key = jax.random.PRNGKey(0)
    ks = jax.random.split(key, 8)
    source = jax.random.normal(ks[0], (B, D), jnp.float32)            # one-step query
    src_bank = jax.random.normal(ks[1], (S_src, B, D), jnp.float32)
    qa_sent_bank = jax.random.normal(ks[2], (S_q, B, D), jnp.float32)
    qa_word_bank = jax.random.normal(ks[3], (W, B, S_q, D), jnp.float32)
    src_lengths = jnp.array([S_src, 7, 5, S_src, 3, 8], jnp.int32)
    qa_sent_lengths = jnp.array([S_q, 3, 2, 4, 1, 3], jnp.int32)
    qa_word_lengths = jnp.array([[6, 3, 4, 2],
                                 [5, 6, 1, 4],
                                 [2, 2, 6, 3],
                                 [6, 6, 6, 6],
                                 [1, 4, 3, 5],
                                 [4, 1, 2, 6]], jnp.int32)

    lim = 1.0 / (D ** 0.5)  # PyTorch nn.Linear default init range
    w_pass = jax.random.uniform(ks[4], (D, D), jnp.float32, -lim, lim)
    w_qa_word = jax.random.uniform(ks[5], (D, D), jnp.float32, -lim, lim)
    w_qa_sent = jax.random.uniform(ks[6], (D, D), jnp.float32, -lim, lim)

    names = ["c", "align_vectors", "src_vectors", "qa_hier_vectors"]

    # --- f32 path (auto batch tile) vs pure-f32 reference: tight logic check ---
    outs32 = hierarchical_attention(source, src_bank, src_lengths,
                                    qa_sent_bank, qa_sent_lengths,
                                    qa_word_bank, qa_word_lengths,
                                    w_pass, w_qa_word, w_qa_sent,
                                    compute_dtype=jnp.float32)
    outs32 = jax.block_until_ready(outs32)
    refs32 = reference_forward(source, src_bank, src_lengths,
                               qa_sent_bank, qa_sent_lengths,
                               qa_word_bank, qa_word_lengths,
                               w_pass, w_qa_word, w_qa_sent,
                               compute_dtype=jnp.float32)
    for name, o, r in zip(names, outs32, refs32):
        assert o.shape == r.shape, (name, o.shape, r.shape)
        assert jnp.allclose(o, r, rtol=5e-3, atol=5e-3), (
            "f32", name, float(jnp.max(jnp.abs(o - r))))

    # --- bf16 banks/queries (default perf config, explicit tile -> padding path)
    #     vs a reference with matching precision casts ---
    outs16 = hierarchical_attention(source, src_bank, src_lengths,
                                    qa_sent_bank, qa_sent_lengths,
                                    qa_word_bank, qa_word_lengths,
                                    w_pass, w_qa_word, w_qa_sent,
                                    compute_dtype=jnp.bfloat16,
                                    batch_tile=4)   # Bp=8, grid=(2,1)
    outs16 = jax.block_until_ready(outs16)
    refs16 = reference_forward(source, src_bank, src_lengths,
                               qa_sent_bank, qa_sent_lengths,
                               qa_word_bank, qa_word_lengths,
                               w_pass, w_qa_word, w_qa_sent,
                               compute_dtype=jnp.bfloat16)
    for name, o, r in zip(names, outs16, refs16):
        assert o.shape == r.shape, (name, o.shape, r.shape)
        assert jnp.allclose(o, r, rtol=2e-2, atol=2e-2), (
            "bf16", name, float(jnp.max(jnp.abs(o - r))))

    print("KERNEL_OK")
</pallas_src>

<mosaic_0001>
module attributes {stable_mosaic.version = 11 : i64} {
  func.func @_hier_attn_kernel(%arg0: i32, %arg1: i32, %arg2: memref<3x1x1xi32, #tpu.memory_space<vmem>>, %arg3: memref<3x1x4xi32, #tpu.memory_space<vmem>>, %arg4: memref<3x1x32xf32, #tpu.memory_space<vmem>>, %arg5: memref<3x1x32xf32, #tpu.memory_space<vmem>>, %arg6: memref<3x1x32xf32, #tpu.memory_space<vmem>>, %arg7: memref<3x10x32xf32, #tpu.memory_space<vmem>>, %arg8: memref<3x4x32xf32, #tpu.memory_space<vmem>>, %arg9: memref<3x24x32xf32, #tpu.memory_space<vmem>>, %arg10: memref<3x1x32xf32, #tpu.memory_space<vmem>>, %arg11: memref<3x1x256xf32, #tpu.memory_space<vmem>>, %arg12: memref<3x1x128xf32, #tpu.memory_space<vmem>>, %arg13: memref<3x1x128xf32, #tpu.memory_space<vmem>>) attributes {dimension_semantics = [#tpu.dimension_semantics<parallel>, #tpu.dimension_semantics<arbitrary>], iteration_bounds = array<i64: 2, 1>, scalar_prefetch = 0 : i64, scratch_operands = 0 : i64, tpu.core_type = #tpu.core_type<tc>, window_params = [{transform_indices = @transform_0, window_bounds = array<i64: 3, 1, 1>}, {transform_indices = @transform_1, window_bounds = array<i64: 3, 1, 4>}, {transform_indices = @transform_2, window_bounds = array<i64: 3, 1, 32>}, {transform_indices = @transform_3, window_bounds = array<i64: 3, 1, 32>}, {transform_indices = @transform_4, window_bounds = array<i64: 3, 1, 32>}, {transform_indices = @transform_5, window_bounds = array<i64: 3, 10, 32>}, {transform_indices = @transform_6, window_bounds = array<i64: 3, 4, 32>}, {transform_indices = @transform_7, window_bounds = array<i64: 3, 24, 32>}, {transform_indices = @transform_8, window_bounds = array<i64: 3, 1, 32>}, {transform_indices = @transform_9, window_bounds = array<i64: 3, 1, 256>}, {transform_indices = @transform_10, window_bounds = array<i64: 3, 1, 128>}, {transform_indices = @transform_11, window_bounds = array<i64: 3, 1, 128>}]} {
    %c0 = arith.constant 0 : index
    %c0_0 = arith.constant 0 : index
    %c0_1 = arith.constant 0 : index
    %0 = vector.load %arg4[%c0, %c0_0, %c0_1] : memref<3x1x32xf32, #tpu.memory_space<vmem>>, vector<3x1x32xf32>
    %c0_2 = arith.constant 0 : index
    %c0_3 = arith.constant 0 : index
    %c0_4 = arith.constant 0 : index
    %1 = vector.load %arg5[%c0_2, %c0_3, %c0_4] : memref<3x1x32xf32, #tpu.memory_space<vmem>>, vector<3x1x32xf32>
    %c0_5 = arith.constant 0 : index
    %c0_6 = arith.constant 0 : index
    %c0_7 = arith.constant 0 : index
    %2 = vector.load %arg6[%c0_5, %c0_6, %c0_7] : memref<3x1x32xf32, #tpu.memory_space<vmem>>, vector<3x1x32xf32>
    %c0_8 = arith.constant 0 : index
    %c0_9 = arith.constant 0 : index
    %c0_10 = arith.constant 0 : index
    %3 = vector.load %arg7[%c0_8, %c0_9, %c0_10] : memref<3x10x32xf32, #tpu.memory_space<vmem>>, vector<3x10x32xf32>
    %c0_11 = arith.constant 0 : index
    %c0_12 = arith.constant 0 : index
    %c0_13 = arith.constant 0 : index
    %4 = vector.load %arg8[%c0_11, %c0_12, %c0_13] : memref<3x4x32xf32, #tpu.memory_space<vmem>>, vector<3x4x32xf32>
    %c0_14 = arith.constant 0 : index
    %c0_15 = arith.constant 0 : index
    %c0_16 = arith.constant 0 : index
    %5 = vector.load %arg9[%c0_14, %c0_15, %c0_16] : memref<3x24x32xf32, #tpu.memory_space<vmem>>, vector<3x24x32xf32>
    "tpu.trace_start"() <{level = 10 : i32, message = "btd,bsd->bts"}> : () -> ()
    %cst = arith.constant dense<0.000000e+00> : vector<3x1x10xf32>
    %6 = tpu.matmul %0, %3, %cst {dimension_numbers = #tpu.dot_dimension_numbers<[2], [2], [1], [1], [0, 0, 0, 1, 1, 1], [0], [0]>} : vector<3x1x32xf32>, vector<3x10x32xf32>, vector<3x1x10xf32> -> vector<3x1x10xf32>
    %cst_17 = arith.constant dense<0.000000e+00> : vector<3x1x24xf32>
    %7 = tpu.matmul %1, %5, %cst_17 {dimension_numbers = #tpu.dot_dimension_numbers<[2], [2], [1], [1], [0, 0, 0, 1, 1, 1], [0], [0]>} : vector<3x1x32xf32>, vector<3x24x32xf32>, vector<3x1x24xf32> -> vector<3x1x24xf32>
    %cst_18 = arith.constant dense<0.000000e+00> : vector<3x1x4xf32>
    %8 = tpu.matmul %2, %4, %cst_18 {dimension_numbers = #tpu.dot_dimension_numbers<[2], [2], [1], [1], [0, 0, 0, 1, 1, 1], [0], [0]>} : vector<3x1x32xf32>, vector<3x4x32xf32>, vector<3x1x4xf32> -> vector<3x1x4xf32>
    "tpu.trace_stop"() : () -> ()
    %9 = tpu.iota {dimensions = array<i32: 1>} : vector<4x24xi32>
    %10 = tpu.iota {dimensions = array<i32: 0>} : vector<4x24xi32>
    %c6_i32 = arith.constant 6 : i32
    %11 = vector.broadcast %c6_i32 : i32 to vector<4x24xi32>
    %12 = arith.muli %10, %11 : vector<4x24xi32>
    %13 = arith.cmpi sge, %9, %12 : vector<4x24xi32>
    %c6_i32_19 = arith.constant 6 : i32
    %14 = vector.broadcast %c6_i32_19 : i32 to vector<4x24xi32>
    %15 = arith.muli %10, %14 : vector<4x24xi32>
    %c6_i32_20 = arith.constant 6 : i32
    %16 = vector.broadcast %c6_i32_20 : i32 to vector<4x24xi32>
    %17 = arith.addi %15, %16 : vector<4x24xi32>
    %18 = arith.cmpi slt, %9, %17 : vector<4x24xi32>
    %19 = arith.andi %13, %18 : vector<4x24xi1>
    %20 = arith.extui %19 : vector<4x24xi1> to vector<4x24xi32>
    %21 = arith.sitofp %20 : vector<4x24xi32> to vector<4x24xf32>
    %22 = vector.shape_cast %21 : vector<4x24xf32> to vector<1x4x24xf32>
    %23 = vector.shape_cast %22 : vector<1x4x24xf32> to vector<1x4x24xf32>
    %24 = vector.broadcast %23 : vector<1x4x24xf32> to vector<3x4x24xf32>
    "tpu.trace_start"() <{level = 10 : i32, message = "bts,bsw->btw"}> : () -> ()
    %cst_21 = arith.constant dense<0.000000e+00> : vector<3x1x24xf32>
    %25 = tpu.matmul %8, %24, %cst_21 {dimension_numbers = #tpu.dot_dimension_numbers<[2], [1], [1], [2], [0, 0, 0, 1, 1, 2], [0], [0]>} : vector<3x1x4xf32>, vector<3x4x24xf32>, vector<3x1x24xf32> -> vector<3x1x24xf32>
    "tpu.trace_stop"() : () -> ()
    %26 = arith.mulf %7, %25 : vector<3x1x24xf32>
    %c0_22 = arith.constant 0 : index
    %c0_23 = arith.constant 0 : index
    %c0_24 = arith.constant 0 : index
    %27 = vector.load %arg2[%c0_22, %c0_23, %c0_24] : memref<3x1x1xi32, #tpu.memory_space<vmem>>, vector<3x1x1xi32>
    %28 = tpu.iota {dimensions = array<i32: 2>} : vector<3x1x10xi32>
    %29 = vector.broadcast %27 : vector<3x1x1xi32> to vector<3x1x10xi32>
    %30 = arith.cmpi slt, %28, %29 : vector<3x1x10xi32>
    %c0_25 = arith.constant 0 : index
    %c0_26 = arith.constant 0 : index
    %c0_27 = arith.constant 0 : index
    %31 = vector.load %arg3[%c0_25, %c0_26, %c0_27] : memref<3x1x4xi32, #tpu.memory_space<vmem>>, vector<3x1x4xi32>
    %32 = tpu.iota {dimensions = array<i32: 2>} : vector<3x1x4xi32>
    %c6_i32_28 = arith.constant 6 : i32
    %33 = vector.broadcast %c6_i32_28 : i32 to vector<3x1x4xi32>
    %34 = arith.muli %32, %33 : vector<3x1x4xi32>
    %35 = arith.addi %34, %31 : vector<3x1x4xi32>
    %36 = arith.sitofp %35 : vector<3x1x4xi32> to vector<3x1x4xf32>
    "tpu.trace_start"() <{level = 10 : i32, message = "bts,bsw->btw"}> : () -> ()
    %cst_29 = arith.constant dense<0.000000e+00> : vector<3x1x24xf32>
    %37 = tpu.matmul %36, %24, %cst_29 {dimension_numbers = #tpu.dot_dimension_numbers<[2], [1], [1], [2], [0, 0, 0, 1, 1, 2], [0], [0]>} : vector<3x1x4xf32>, vector<3x4x24xf32>, vector<3x1x24xf32> -> vector<3x1x24xf32>
    "tpu.trace_stop"() : () -> ()
    %38 = tpu.iota {dimensions = array<i32: 2>} : vector<3x1x24xi32>
    %39 = arith.sitofp %38 : vector<3x1x24xi32> to vector<3x1x24xf32>
    %40 = arith.cmpf olt, %39, %37 : vector<3x1x24xf32>
    %cst_30 = arith.constant 0xFF800000 : f32
    %41 = vector.broadcast %cst_30 : f32 to vector<3x1x10xf32>
    %42 = arith.select %30, %6, %41 : vector<3x1x10xi1>, vector<3x1x10xf32>
    %cst_31 = arith.constant 0xFF800000 : f32
    %43 = vector.broadcast %cst_31 : f32 to vector<3x1x24xf32>
    %44 = arith.select %40, %26, %43 : vector<3x1x24xi1>, vector<3x1x24xf32>
    %cst_32 = arith.constant dense<0xFF800000> : vector<3x1xf32>
    %45 = vector.multi_reduction <maximumf>, %42, %cst_32 [2] : vector<3x1x10xf32> to vector<3x1xf32>
    %46 = vector.shape_cast %45 : vector<3x1xf32> to vector<3x1x1xf32>
    %cst_33 = arith.constant -1.000000e+30 : f32
    %47 = vector.broadcast %cst_33 : f32 to vector<3x1x1xf32>
    %48 = arith.maximumf %46, %47 : vector<3x1x1xf32>
    %cst_34 = arith.constant dense<0xFF800000> : vector<3x1xf32>
    %49 = vector.multi_reduction <maximumf>, %44, %cst_34 [2] : vector<3x1x24xf32> to vector<3x1xf32>
    %50 = vector.shape_cast %49 : vector<3x1xf32> to vector<3x1x1xf32>
    %cst_35 = arith.constant -1.000000e+30 : f32
    %51 = vector.broadcast %cst_35 : f32 to vector<3x1x1xf32>
    %52 = arith.maximumf %50, %51 : vector<3x1x1xf32>
    %53 = vector.broadcast %48 : vector<3x1x1xf32> to vector<3x1x10xf32>
    %54 = arith.subf %42, %53 : vector<3x1x10xf32>
    %55 = math.exp %54 : vector<3x1x10xf32>
    %56 = vector.broadcast %52 : vector<3x1x1xf32> to vector<3x1x24xf32>
    %57 = arith.subf %44, %56 : vector<3x1x24xf32>
    %58 = math.exp %57 : vector<3x1x24xf32>
    %cst_36 = arith.constant dense<0.000000e+00> : vector<3x1xf32>
    %59 = vector.multi_reduction <add>, %55, %cst_36 [2] : vector<3x1x10xf32> to vector<3x1xf32>
    %60 = vector.shape_cast %59 : vector<3x1xf32> to vector<3x1x1xf32>
    %cst_37 = arith.constant dense<0.000000e+00> : vector<3x1xf32>
    %61 = vector.multi_reduction <add>, %58, %cst_37 [2] : vector<3x1x24xf32> to vector<3x1xf32>
    %62 = vector.shape_cast %61 : vector<3x1xf32> to vector<3x1x1xf32>
    %63 = tpu.reciprocal %60 {approx = true} : vector<3x1x1xf32> -> vector<3x1x1xf32>
    %64 = vector.broadcast %63 : vector<3x1x1xf32> to vector<3x1x10xf32>
    %65 = arith.mulf %55, %64 : vector<3x1x10xf32>
    %66 = tpu.reciprocal %62 {approx = true} : vector<3x1x1xf32> -> vector<3x1x1xf32>
    %67 = vector.broadcast %66 : vector<3x1x1xf32> to vector<3x1x24xf32>
    %68 = arith.mulf %58, %67 : vector<3x1x24xf32>
    %69 = arith.maximumf %48, %52 : vector<3x1x1xf32>
    %70 = arith.subf %48, %69 : vector<3x1x1xf32>
    %71 = math.exp %70 : vector<3x1x1xf32>
    %72 = arith.subf %52, %69 : vector<3x1x1xf32>
    %73 = math.exp %72 : vector<3x1x1xf32>
    %74 = arith.mulf %71, %60 : vector<3x1x1xf32>
    %75 = arith.mulf %73, %62 : vector<3x1x1xf32>
    %76 = arith.addf %74, %75 : vector<3x1x1xf32>
    %77 = tpu.reciprocal %76 {approx = true} : vector<3x1x1xf32> -> vector<3x1x1xf32>
    %78 = arith.mulf %71, %77 : vector<3x1x1xf32>
    %79 = vector.broadcast %78 : vector<3x1x1xf32> to vector<3x1x10xf32>
    %80 = arith.mulf %55, %79 : vector<3x1x10xf32>
    %81 = arith.mulf %73, %77 : vector<3x1x1xf32>
    %82 = vector.broadcast %81 : vector<3x1x1xf32> to vector<3x1x24xf32>
    %83 = arith.mulf %58, %82 : vector<3x1x24xf32>
    "tpu.trace_start"() <{level = 10 : i32, message = "bts,bsd->btd"}> : () -> ()
    %cst_38 = arith.constant dense<0.000000e+00> : vector<3x1x32xf32>
    %84 = tpu.matmul %80, %3, %cst_38 {dimension_numbers = #tpu.dot_dimension_numbers<[2], [1], [1], [2], [0, 0, 0, 1, 1, 2], [0], [0]>} : vector<3x1x10xf32>, vector<3x10x32xf32>, vector<3x1x32xf32> -> vector<3x1x32xf32>
    %cst_39 = arith.constant dense<0.000000e+00> : vector<3x1x32xf32>
    %85 = tpu.matmul %83, %5, %cst_39 {dimension_numbers = #tpu.dot_dimension_numbers<[2], [1], [1], [2], [0, 0, 0, 1, 1, 2], [0], [0]>} : vector<3x1x24xf32>, vector<3x24x32xf32>, vector<3x1x32xf32> -> vector<3x1x32xf32>
    "tpu.trace_stop"() : () -> ()
    %86 = arith.addf %84, %85 : vector<3x1x32xf32>
    %c0_40 = arith.constant 0 : index
    %c0_41 = arith.constant 0 : index
    %c0_42 = arith.constant 0 : index
    %87 = vector.load %arg10[%c0_40, %c0_41, %c0_42] : memref<3x1x32xf32, #tpu.memory_space<vmem>>, vector<3x1x32xf32>
    tpu.vector_store %arg10[%c0_40, %c0_41, %c0_42], %86 {strides = array<i32>} : memref<3x1x32xf32, #tpu.memory_space<vmem>>, vector<3x1x32xf32>,
    %cst_43 = arith.constant 0.000000e+00 : f32
    %88 = vector.broadcast %cst_43 : f32 to vector<3x1x118xf32>
    %89 = tpu.concatenate %65, %88 in 2 : vector<3x1x10xf32>, vector<3x1x118xf32> -> vector<3x1x128xf32>
    %c0_44 = arith.constant 0 : index
    %c0_45 = arith.constant 0 : index
    %c0_46 = arith.constant 0 : index
    %90 = vector.load %arg12[%c0_44, %c0_45, %c0_46] : memref<3x1x128xf32, #tpu.memory_space<vmem>>, vector<3x1x128xf32>
    tpu.vector_store %arg12[%c0_44, %c0_45, %c0_46], %89 {strides = array<i32>} : memref<3x1x128xf32, #tpu.memory_space<vmem>>, vector<3x1x128xf32>,
    %cst_47 = arith.constant 0.000000e+00 : f32
    %91 = vector.broadcast %cst_47 : f32 to vector<3x1x104xf32>
    %92 = tpu.concatenate %68, %91 in 2 : vector<3x1x24xf32>, vector<3x1x104xf32> -> vector<3x1x128xf32>
    %c0_48 = arith.constant 0 : index
    %c0_49 = arith.constant 0 : index
    %c0_50 = arith.constant 0 : index
    %93 = vector.load %arg13[%c0_48, %c0_49, %c0_50] : memref<3x1x128xf32, #tpu.memory_space<vmem>>, vector<3x1x128xf32>
    tpu.vector_store %arg13[%c0_48, %c0_49, %c0_50], %92 {strides = array<i32>} : memref<3x1x128xf32, #tpu.memory_space<vmem>>, vector<3x1x128xf32>,
    %cst_51 = arith.constant 0.000000e+00 : f32
    %94 = vector.broadcast %cst_51 : f32 to vector<3x1x118xf32>
    %95 = tpu.concatenate %80, %94 in 2 : vector<3x1x10xf32>, vector<3x1x118xf32> -> vector<3x1x128xf32>
    %c0_52 = arith.constant 0 : index
    %c0_53 = arith.constant 0 : index
    %c0_54 = arith.constant 0 : index
    %96 = vector.load %arg11[%c0_52, %c0_53, %c0_54] : memref<3x1x256xf32, #tpu.memory_space<vmem>>, vector<3x1x128xf32>
    tpu.vector_store %arg11[%c0_52, %c0_53, %c0_54], %95 {strides = array<i32>} : memref<3x1x256xf32, #tpu.memory_space<vmem>>, vector<3x1x128xf32>,
    %cst_55 = arith.constant 0.000000e+00 : f32
    %97 = vector.broadcast %cst_55 : f32 to vector<3x1x104xf32>
    %98 = tpu.concatenate %83, %97 in 2 : vector<3x1x24xf32>, vector<3x1x104xf32> -> vector<3x1x128xf32>
    %c0_56 = arith.constant 0 : index
    %c0_57 = arith.constant 0 : index
    %c128 = arith.constant 128 : index
    %99 = vector.load %arg11[%c0_56, %c0_57, %c128] : memref<3x1x256xf32, #tpu.memory_space<vmem>>, vector<3x1x128xf32>
    tpu.vector_store %arg11[%c0_56, %c0_57, %c128], %98 {strides = array<i32>} : memref<3x1x256xf32, #tpu.memory_space<vmem>>, vector<3x1x128xf32>,
    return
  }
  func.func @transform_0(%arg0: i32, %arg1: i32) -> (i32, i32, i32) {
    %c0_i32 = arith.constant 0 : i32
    %c0_i32_0 = arith.constant 0 : i32
    %c0_i32_1 = arith.constant 0 : i32
    return %arg0, %c0_i32, %c0_i32_0 : i32, i32, i32
  }
  func.func @transform_1(%arg0: i32, %arg1: i32) -> (i32, i32, i32) {
    %c0_i32 = arith.constant 0 : i32
    %c0_i32_0 = arith.constant 0 : i32
    %c0_i32_1 = arith.constant 0 : i32
    return %arg0, %c0_i32, %c0_i32_0 : i32, i32, i32
  }
  func.func @transform_2(%arg0: i32, %arg1: i32) -> (i32, i32, i32) {
    %c0_i32 = arith.constant 0 : i32
    %c0_i32_0 = arith.constant 0 : i32
    return %arg0, %arg1, %c0_i32 : i32, i32, i32
  }
  func.func @transform_3(%arg0: i32, %arg1: i32) -> (i32, i32, i32) {
    %c0_i32 = arith.constant 0 : i32
    %c0_i32_0 = arith.constant 0 : i32
    return %arg0, %arg1, %c0_i32 : i32, i32, i32
  }
  func.func @transform_4(%arg0: i32, %arg1: i32) -> (i32, i32, i32) {
    %c0_i32 = arith.constant 0 : i32
    %c0_i32_0 = arith.constant 0 : i32
    return %arg0, %arg1, %c0_i32 : i32, i32, i32
  }
  func.func @transform_5(%arg0: i32, %arg1: i32) -> (i32, i32, i32) {
    %c0_i32 = arith.constant 0 : i32
    %c0_i32_0 = arith.constant 0 : i32
    %c0_i32_1 = arith.constant 0 : i32
    return %arg0, %c0_i32, %c0_i32_0 : i32, i32, i32
  }
  func.func @transform_6(%arg0: i32, %arg1: i32) -> (i32, i32, i32) {
    %c0_i32 = arith.constant 0 : i32
    %c0_i32_0 = arith.constant 0 : i32
    %c0_i32_1 = arith.constant 0 : i32
    return %arg0, %c0_i32, %c0_i32_0 : i32, i32, i32
  }
  func.func @transform_7(%arg0: i32, %arg1: i32) -> (i32, i32, i32) {
    %c0_i32 = arith.constant 0 : i32
    %c0_i32_0 = arith.constant 0 : i32
    %c0_i32_1 = arith.constant 0 : i32
    return %arg0, %c0_i32, %c0_i32_0 : i32, i32, i32
  }
  func.func @transform_8(%arg0: i32, %arg1: i32) -> (i32, i32, i32) {
    %c0_i32 = arith.constant 0 : i32
    %c0_i32_0 = arith.constant 0 : i32
    return %arg0, %arg1, %c0_i32 : i32, i32, i32
  }
  func.func @transform_9(%arg0: i32, %arg1: i32) -> (i32, i32, i32) {
    %c0_i32 = arith.constant 0 : i32
    %c0_i32_0 = arith.constant 0 : i32
    return %arg0, %arg1, %c0_i32 : i32, i32, i32
  }
  func.func @transform_10(%arg0: i32, %arg1: i32) -> (i32, i32, i32) {
    %c0_i32 = arith.constant 0 : i32
    %c0_i32_0 = arith.constant 0 : i32
    return %arg0, %arg1, %c0_i32 : i32, i32, i32
  }
  func.func @transform_11(%arg0: i32, %arg1: i32) -> (i32, i32, i32) {
    %c0_i32 = arith.constant 0 : i32
    %c0_i32_0 = arith.constant 0 : i32
    return %arg0, %arg1, %c0_i32 : i32, i32, i32
  }
}

</mosaic_0001>

<bundles_post_ra>
// kernel: tpu_custom_call.1
= control target key start
LH: loop header
LB: loop body
LE: loop exit
PB: predicated region body
PF: predicated region fallthrough
CT: control target
= control target key end

     0   :  { %s4069_s0 = inlined_call_operand.vmem [shape: s32[6,1,1], index: 0, kind: input, shape index: {}]   ;;  %s4070_s1 = inlined_call_operand.vmem [shape: s32[6,1,4], index: 1, kind: input, shape index: {}]   ;;  %s4071_s2 = inlined_call_operand.vmem [shape: f32[6,1,32], index: 2, kind: input, shape index: {}]   ;;  %s4072_s3 = inlined_call_operand.vmem [shape: f32[6,1,32], index: 3, kind: input, shape index: {}]   ;;  %s4073_s4 = inlined_call_operand.vmem [shape: f32[6,1,32], index: 4, kind: input, shape index: {}]   ;;  %s4074_s5 = inlined_call_operand.vmem [shape: f32[6,10,32], index: 5, kind: input, shape index: {}]   ;;  %s4075_s6 = inlined_call_operand.vmem [shape: f32[6,4,32], index: 6, kind: input, shape index: {}]   ;;  %s4076_s7 = inlined_call_operand.vmem [shape: f32[6,24,32], index: 7, kind: input, shape index: {}]   ;;  %s4077_s8 = inlined_call_operand.hbm [shape: f32[6,1,32], index: 8, kind: output, shape index: {0}]   ;;  %s4078_s9 = inlined_call_operand.hbm [shape: f32[6,1,256], index: 9, kind: output, shape index: {1}]   ;;  %s4079_s10 = inlined_call_operand.hbm [shape: f32[6,1,128], index: 10, kind: output, shape index: {2}]   ;;  %s4080_s11 = inlined_call_operand.hbm [shape: f32[6,1,128], index: 11, kind: output, shape index: {3}]  }
   0x1   :  { %4083 = sst [smem:[#allocation12_spill]] %s4069_s0 }
   0x2   :  { %4084 = sst [smem:[#allocation13_spill]] %s4070_s1 }
   0x3   :  { %4085 = sst [smem:[#allocation14_spill]] %s4071_s2 }
   0x4   :  { %4086 = sst [smem:[#allocation15_spill]] %s4072_s3 }
   0x5   :  { %4087 = sst [smem:[#allocation16_spill]] %s4073_s4 }
   0x6   :  { %4088 = sst [smem:[#allocation17_spill]] %s4074_s5 }
   0x7   :  { %4089 = sst [smem:[#allocation18_spill]] %s4075_s6 }
   0x8   :  { %4090 = sst [smem:[#allocation19_spill]] %s4076_s7 }
   0x9   :  { %4091 = sst [smem:[#allocation20_spill]] %s4078_s9 }
   0xa   :  { %17 = vsyncpa [#allocation3], 0 }
   0xb   :  { %19 = vsyncpa [#allocation3 + $0x1], 0 }
   0xc   :  { %20 = vsyncpa [#allocation5], 0 }
   0xd   :  { %22 = vsyncpa [#allocation5 + $0x1], 0 }
   0xe   :  { %23 = vsyncpa [#allocation8], 0 }
   0xf   :  { %25 = vsyncpa [#allocation8 + $0x1], 0  ;;  %s3486_s17 = smov 0   ;;  %s3488_s18 = smov 0  }
  0x10   :  { %s3490_s19 = smov 0   ;;  %s3492_s20 = smov 0  }
  0x11   :  { %s3494_s21 = smov 0   ;;  %s3496_s22 = smov 0  }
  0x12 LB: > { %s4082_s23 = sadd.s32 4294967295, %s3411_s22   ;;  %s4081_s24 = sadd.s32 4294967294, %s3411_s22   ;;  %s3411_s22 = sphi %s3496_s22, %s31_s22   ;;  %s3407_s21 = sphi %s3494_s21, %s4116_s21   ;;  %s3403_s20 = sphi %s3492_s20, %s4115_s20   ;;  %s3399_s19 = sphi %s3490_s19, %s4114_s19   ;;  %s3395_s18 = sphi %s3488_s18, %s4113_s18   ;;  %s3391_s17 = sphi %s3486_s17, %s4112_s17  }
  0x13   : > { %s43_s25 = sadd.s32 1, %s3407_s21  ;;  %s266_s26 = sadd.s32 1, %s3399_s19 }
  0x14   : > { %p45_p0 = scmp.ge.s32.totalorder %s43_s25, 2  ;;  %p276_p1 = scmp.ne.s32.totalorder %s3399_s19, %s3395_s18 }
  0x15   : > { %p277_p2 = scmp.eq.s32.totalorder %s4082_s23, 1  ;;  %p282_p3 = scmp.ne.s32.totalorder %s3395_s18, %s3391_s17 }
  0x16   : > { %s4118_s25 = smov (%p45_p0, %s43_s25), 0  ;;  %p283_p5 = scmp.eq.s32.totalorder %s4081_s24, 1 }
  0x17   : > { %p3528_p4 = por %p277_p2, %p276_p1  ;;  %s261_s28 = ssub.s32 %s3407_s21, %s4118_s25 }
  0x18   : > { %p2795_p6 = scmp.ge.s32.totalorder %s3411_s22, 1  ;;  %p264_p7 = scmp.eq.s32.totalorder %s261_s28, 0 }
  0x19   : > { %p3537_p8 = por %p283_p5, %p282_p3  ;;  %p463_p9 = scmp.lt.s32.totalorder %s3411_s22, 3 }
  0x1a   : > { %s3543_s30 = scalar_select %p264_p7, %s3399_s19, %s266_s26  }
  0x1b   : > { %p464_p10 = pnand %p2795_p6, %p463_p9 }
  0x1c   : > { %s559_s12 = smul.u32 (!%p464_p10), 3, %s3403_s20  ;;  %v3413_v0 = vmov (!%p464_p10), 0.0|0.0   ;;  %vm3414_vm0 = vmmov (!%p464_p10), 0   ;;  %v3415_v1 = vmov (!%p464_p10), 0.0   ;;  %v3416_v2 = vmov (!%p464_p10), 0   ;;  %s4094_s5 = sld [smem:[#allocation17_spill]] (!%p464_p10) }
  0x1d   : > { %467 = sbr.rel (%p464_p10) target bundleno = 1070 (0x42e), region = 52  ;;  %3064 = vmatprep.subr.bf16.mxu0 (!%p464_p10), %v3413_v0  ;;  %3068 = vmatprep.subr.bf16.mxu1 (!%p464_p10), %v3413_v0  ;;  %vm644_vm1 = vcmask (!%p464_p10), 261120   ;;  %s4097_s7 = sld [smem:[#allocation19_spill]] (!%p464_p10)  ;;  %v1356_v40 = vlaneseq (!%p464_p10)  ;;  %vm1371_vm5 = vcmask (!%p464_p10), 1043456   ;;  %vm1860_vm9 = vcmask (!%p464_p10), 73728  }
  0x1e   : > { %p560_p11 = scmp.lt.s32.totalorder (!%p464_p10), %s559_s12, 5  ;;  %2927 = vmatprep.mubr.msk.f32.mxu0 (!%p464_p10), %vm3414_vm0, %v3415_v1  ;;  %2934 = vmatprep.mubr.msk.f32.mxu1 (!%p464_p10), %vm3414_vm0, %v3415_v1  ;;  %vm3560_vm2 = vmpackc.low (!%p464_p10), %vm644_vm1, %vm644_vm1  ;;  %s4098_s2 = sld [smem:[#allocation14_spill]] (!%p464_p10)  ;;  %vm1367_vm11 = vcmask (!%p464_p10), 31744   ;;  %vm1873_vm13 = vcmask (!%p464_p10), 188416  }
  0x1f   : > { %3197 = vset.pattern.permute.xlu0 (!%p464_p10), %v3416_v2  ;;  %3198 = vset.pattern.permute.xlu1 (!%p464_p10), %v3416_v2  ;;  %s4099_s0 = sld [smem:[#allocation12_spill]] (!%p464_p10)  ;;  %s4100_s3 = sld [smem:[#allocation15_spill]] (!%p464_p10)  ;;  %v1359_v41 = vshrl.u32 (!%p464_p10), %v1356_v40, 7  ;;  %v3685_v44 = vand.u32 (!%p464_p10), 127, %v1356_v40 }
  0x20   : > { %s4101_s6 = sld [smem:[#allocation18_spill]] (!%p464_p10)  ;;  %s4102_s4 = sld [smem:[#allocation16_spill]] (!%p464_p10) }
  0x21   : > { %v1360_v42 = vmul.u32 (!%p464_p10), 6, %v1359_v41  ;;  %v1602_v47 = vsub.s32 (!%p464_p10), 0, %v1359_v41  ;;  %s4103_s1 = sld [smem:[#allocation13_spill]] (!%p464_p10)  ;;  %s4109_s9 = sld [smem:[#allocation20_spill]] (!%p464_p10) }
  0x23   : > { %v1362_v43 = vadd.s32 (!%p464_p10), 6, %v1360_v42  ;;  %vm1361_vm3 = vcmp.ge.s32.totalorder (!%p464_p10), %v3685_v44, %v1360_v42 }
  0x24   : > { %s4120_s12 = smov (!%p560_p11, %s559_s12), 5 }
  0x25   : > { %s2856_s13 = sshll.u32 %s4120_s12, 4  ;;  %s3117_s26 = smul.u32 24, %s4120_s12  ;;  %vm1363_vm4 = vcmp.lt.s32.totalorder %v3685_v44, %v1362_v43 }
  0x26   : > { %s598_s16 = scalar_lea.vmem %s4094_s5, %s2856_s13  ;;  %s575_s23 = scalar_lea.vmem %s4098_s2, %s4120_s12  ;;  %vm1364_vm6 = vmand %vm1361_vm3, %vm1363_vm4  ;;  %vm3819_vm3 = vcmp.lt.s32.totalorder %v1356_v40, 128  ;;  %vm2203_vm4 = vcmask 1041408  }
  0x27   : > { %v626_v4 = vld [vmem:[%s598_s16] sm:$0xff]  ;;  %v627_v5 = vld [vmem:[%s598_s16 + $0x8] sm:$0x3]  ;;  %v628_v6 = vld [vmem:[%s598_s16 + $0x10] sm:$0xff]  ;;  %s3572_s13 = scalar_lea.vmem %s4097_s7, %s3117_s26  ;;  %s562_s28 = scalar_lea.vmem %s4099_s0, %s4120_s12  ;;  %v3690_v45 = vsel %vm1364_vm6, 1.0, %v3415_v1 }
  0x28   : > { %v3565_v7 = vpack.c.bf16 %v627_v5, %v626_v4  ;;  %v629_v8 = vld [vmem:[%s598_s16 + $0x18] sm:$0x3]  ;;  %v630_v10 = vld [vmem:[%s598_s16 + $0x20] sm:$0xff]  ;;  %v631_v11 = vld [vmem:[%s598_s16 + $0x28] sm:$0x3]  ;;  %s583_s15 = scalar_lea.vmem %s4100_s3, %s4120_s12  ;;  %s591_s0 = scalar_lea.vmem %s4102_s4, %s4120_s12  ;;  %v1624_v4 = vmul.u32 6, %v3685_v44 }
  0x29   : > { %v3567_v9 = vpack.c.bf16 %v629_v8, %v628_v6  ;;  %v635_v12 = vld [vmem:[%s3572_s13] sm:$0xff]  ;;  %v636_v13 = vld [vmem:[%s3572_s13 + $0x8] sm:$0xff]  ;;  %v3592_v15 = vpack.c.bf16 %v631_v11, %v630_v10  ;;  %v638_v21 = vld [vmem:[%s3572_s13 + $0x18] sm:$0xff] }
  0x2a   : > { %3067 = vmatpush3.bf16.xpose.msk.msra.mxu0 %vm3560_vm2, %v3565_v7  ;;  %v617_v14 = vld [vmem:[%s575_s23] sm:$0x1]  ;;  %v618_v16 = vld [vmem:[%s575_s23 + $0x1] sm:$0x1]  ;;  %v3594_v17 = vpack.c.bf16 %v636_v13, %v635_v12  ;;  %v1596_v19 = vld [vmem:[%s562_s28 + $0x2] sm:$0x1] }
  0x2b   : > { %3071 = vmatpush3.bf16.xpose.msk.msra.mxu1 %vm3560_vm2, %v3567_v9  ;;  %3072 = vmatprep.subr.bf16.mxu0 %v3413_v0  ;;  %v1594_v18 = vld [vmem:[%s562_s28] sm:$0x1]  ;;  %v1595_v20 = vld [vmem:[%s562_s28 + $0x1] sm:$0x1]  ;;  %v619_v23 = vld [vmem:[%s575_s23 + $0x2] sm:$0x1] }
  0x2c   : > { %3076 = vmatprep.subr.bf16.mxu1 %v3413_v0  ;;  %1598 = vperm.xlu0 %3197, %v1594_v18   ;;  %v639_v22 = vld [vmem:[%s3572_s13 + $0x20] sm:$0xff]  ;;  %v3615_v25 = vld [vmem:[%s3572_s13 + $0x10] sm:$0xff]  ;;  %v642_v27 = vld [vmem:[%s3572_s13 + $0x38] sm:$0xff]  ;;  %s2798_s23 = sshll.u32 %s4120_s12, 2 }
  0x2d   : > { %1612 = vperm.xlu1 %3198, %v1596_v19   ;;  %v3612_v24 = vpack.c.bf16 %v639_v22, %v638_v21  ;;  %v641_v26 = vld [vmem:[%s3572_s13 + $0x30] sm:$0xff]  ;;  %v620_v28 = vld [vmem:[%s583_s15] sm:$0x1]  ;;  %v3641_v30 = vld [vmem:[%s3572_s13 + $0x28] sm:$0xff]  ;;  %s604_s28 = scalar_lea.vmem %s4101_s6, %s2798_s23 }
  0x2e   : > { %v3631_v29 = vpack.c.bf16 %v642_v27, %v641_v26  ;;  %v621_v31 = vld [vmem:[%s583_s15 + $0x1] sm:$0x1]  ;;  %v633_v32 = vld [vmem:[%s604_s28 + $0x4] sm:$0xf]  ;;  %v622_v35 = vld [vmem:[%s583_s15 + $0x2] sm:$0x1]  ;;  %s567_s15 = scalar_lea.vmem %s4103_s1, %s4120_s12 }
  0x2f   : > { %v3657_v33 = vld [vmem:[%s3572_s13 + $0x40] sm:$0xff]  ;;  %v634_v38 = vld [vmem:[%s604_s28 + $0x8] sm:$0xf]  ;;  %s3779_s12 = sand.u32 1, %s3395_s18   ;;  %s4108_s13 = sadd.s32 4294967295, %s3411_s22  }
  0x30   : > { %1605 = vperm.xlu0 %3197, %v1595_v20   ;;  %v624_v34 = vld [vmem:[%s591_s0 + $0x1] sm:$0x1]  ;;  %v623_v37 = vld [vmem:[%s591_s0] sm:$0x1]  ;;  %v625_v39 = vld [vmem:[%s591_s0 + $0x2] sm:$0x1] }
  0x31   : > { %2928 = vmatmul.mubr.msk.f32.vlgmr.msra.gmra.mrb[0].mxu0 %vm644_vm1, %v617_v14  ;;  %v632_v36 = vld [vmem:[%s604_s28] sm:$0xf]  ;;  %s3786_s23 = smul.u32 3, %s3779_s12 }
  0x32   : > { %2935 = vmatmul.mubr.msk.f32.vlgmr.msra.gmra.mrb[0].mxu1 %vm644_vm1, %v618_v16  ;;  %3075 = vmatpush3.bf16.xpose.msk.msra.mxu0 %vm3560_vm2, %v3592_v15  ;;  %v1621_v5 = vld [vmem:[%s567_s15] sm:$0x1]  ;;  %v1623_v11 = vld [vmem:[%s567_s15 + $0x2] sm:$0x1]  ;;  %v1622_v20 = vld [vmem:[%s567_s15 + $0x1] sm:$0x1] }
  0x33   : > { %3079 = vmatpush3.bf16.xpose.msk.msra.mxu1 %vm3560_vm2, %v3594_v17  ;;  %2941 = vmatprep.mubr.msk.f32.mxu0 %vm3414_vm0, %v3415_v1  ;;  %v1625_v10 = vadd.s32 %v1624_v4, %v1621_v5  ;;  %v1627_v18 = vadd.s32 %v1624_v4, %v1623_v11  ;;  %v1626_v26 = vadd.s32 %v1624_v4, %v1622_v20  ;;  %s3805_s24 = scalar_lea.vmem [#allocation6], %s3786_s23  ;;  %s3116_s26 = smul.u32 6, %s3779_s12 }
  0x34   : > { %2948 = vmatprep.subr.mxu1 %v3415_v1  ;;  %3080 = vmatprep.subr.bf16.mxu0 %v3413_v0  ;;  %s3814_s28 = scalar_lea.vmem [#allocation7], %s3786_s23  ;;  %s2524_s14 = sshll.u32 %s3805_s24, 4  ;;  %s3912_s14 = int_to_ptr.vmem [resolvable:$true] %s2524_s14 }
  0x35   : > { %2950 = vmatprep.mubr.msk.f32.mxu1 %vm3414_vm0, %v3415_v1  ;;  %v1628_v16 = vcvt.s32.f32 %v1625_v10  ;;  %v1630_v22 = vcvt.s32.f32 %v1627_v18  ;;  %s3838_s16 = scalar_lea.vmem [#allocation4], %s3116_s26  ;;  %s2862_s0 = smul.u32 96, %s3403_s20 }
  0x36   : > { %s3902_s15 = sand.u32 1, %s4108_s13   ;;  %s2507_s26 = sshll.u32 %s3838_s16, 4  ;;  %s3910_s26 = int_to_ptr.vmem [resolvable:$true] %s2507_s26 }
  0x37   : > { %s3908_s3 = scalar_lea.hbm %s4109_s9, %s2862_s0  ;;  %s3418_s13 = smov [#allocation4]  }
  0x39   : > { %2942 = vmatmul.mubr.msk.f32.vlgmr.msra.gmra.mrb[2].mxu0 %vm644_vm1, %v619_v23 }
  0x3a   : > { %3083 = vmatpush3.bf16.xpose.msk.msra.mxu0 %vm3560_vm2, %v3612_v24  ;;  %2959 = vmatprep.mubr.msk.f32.mxu0 %vm3414_vm0, %v3415_v1 }
  0x3b   : > { %2949 = vmatpush3.xpose.msk.msra.mxu1 %vm644_vm1, %v3615_v25  ;;  %2957 = vmatprep.subr.mxu0 %v3415_v1 }
  0x3c   : > { %3084 = vmatprep.subr.bf16.mxu1 %v3413_v0 }
  0x3e   : > { %2951 = vmatmul.mubr.msk.f32.vlgmr.msra.gmra.mrb[2].mxu1 %vm644_vm1, %v620_v28 }
  0x3f   : > { %3087 = vmatpush3.bf16.xpose.msk.msra.mxu1 %vm3560_vm2, %v3631_v29  ;;  %2968 = vmatprep.mubr.msk.f32.mxu1 %vm3414_vm0, %v3415_v1  ;;  %vm1979_vm2 = vcmask 195584  }
  0x40   : > { %2966 = vmatprep.subr.mxu1 %v3415_v1 }
  0x42   : > { %2958 = vmatpush3.xpose.msk.msra.mxu0 %vm644_vm1, %v3641_v30 }
  0x43   : > { %2976 = vmatprep.subr.mxu0 %v3415_v1 }
  0x45   : > { %2960 = vmatmul.mubr.msk.f32.vlgmr.msra.gmra.mrb[4].mxu0 %vm644_vm1, %v621_v31  ;;  %v1629_v31 = vcvt.s32.f32 %v1626_v26 }
  0x46   : > { %2977 = vmatpush3.xpose.msk.msra.mxu0 %vm644_vm1, %v633_v32  ;;  %2978 = vmatprep.mubr.msk.f32.mxu0 %vm3414_vm0, %v3415_v1 }
  0x47   : > { %2967 = vmatpush3.xpose.msk.msra.mxu1 %vm644_vm1, %v3657_v33  ;;  %2986 = vmatprep.subr.mxu0 %v3415_v1 }
  0x48   : > { %2971 = vmatprep.subr.mxu1 %v3415_v1 }
  0x49   : > { %2979 = vmatmul.mubr.msk.f32.vlgmr.msra.gmra.mrb[6].mxu0 %vm644_vm1, %v624_v34 }
  0x4a   : > { %2969 = vmatmul.mubr.msk.f32.vlgmr.msra.gmra.mrb[4].mxu1 %vm644_vm1, %v622_v35  ;;  %2988 = vmatprep.mubr.msk.f32.mxu0 %vm3414_vm0, %v3415_v1 }
  0x4b   : > { %2972 = vmatpush3.xpose.msk.msra.mxu1 %vm644_vm1, %v632_v36  ;;  %2973 = vmatprep.mubr.msk.f32.mxu1 %vm3414_vm0, %v3415_v1  ;;  %v1850_v36 = vcvt.s32.f32 %v3685_v44 }
  0x4c   : > { %2981 = vmatprep.subr.mxu1 %v3415_v1  ;;  %2987 = vmatpush3.msk.msra.mxu0 %vm1371_vm5, %v3690_v45 }
  0x4d   : > { %2996 = vmatprep.subr.mxu0 %v3415_v1 }
  0x4e   : > { %2974 = vmatmul.mubr.msk.f32.vlgmr.msra.gmra.mrb[6].mxu1 %vm644_vm1, %v623_v37 }
  0x4f   : > { %2982 = vmatpush3.xpose.msk.msra.mxu1 %vm644_vm1, %v634_v38  ;;  %2983 = vmatprep.mubr.msk.f32.mxu1 %vm3414_vm0, %v3415_v1 }
  0x50   : > { %2991 = vmatprep.subr.mxu1 %v3415_v1 }
  0x52   : > { %2984 = vmatmul.mubr.msk.f32.vlgmr.msra.gmra.mrb[8].mxu1 %vm644_vm1, %v625_v39  ;;  %vm2199_vm1 = vcmask 80896  }
  0x53   : > { %2993 = vmatprep.mubr.msk.f32.mxu1 %vm3414_vm0, %v3415_v1  ;;  %2992 = vmatpush3.msk.msra.mxu1 %vm1371_vm5, %v3690_v45 }
  0x54   : > { %3001 = vmatprep.subr.mxu1 %v3415_v1 }
  0xab   : > { %v1599_v46 = vpop.permute.xlu0 %1598 }
  0xac   : > { %v1603_v49 = vrot.slane %v1599_v46, %v1602_v47  ;;  %v1613_v51 = vpop.permute.xlu1 %1612 }
  0xad   : > { %v1617_v59 = vrot.slane %v1613_v51, %v1602_v47 }
  0xae   : > { %vm1618_vm7 = vcmp.lt.s32.totalorder %v3685_v44, %v1603_v49 }
  0xaf   : > { %v1606_v48 = vpop.permute.xlu0 %1605  ;;  %vm1620_vm10 = vcmp.lt.s32.totalorder %v3685_v44, %v1617_v59 }
  0xb0   : > { %v1610_v50 = vrot.slane %v1606_v48, %v1602_v47 }
  0xb2   : > { %vm1619_vm8 = vcmp.lt.s32.totalorder %v3685_v44, %v1610_v50 }
 0x104   : > { %v720_v52 = vpop.f32.mrb[0].mxu0 }
 0x105   : > { %v3700_v53 = vsel %vm1618_vm7, %v720_v52, -inf  ;;  %v799_v54 = vpop.f32.mrb[0].mxu1  ;;  %v2929_v55 = vpop.f32.mrb[1].mxu0 }
 0x106   : > { %v3702_v56 = vsel %vm1619_vm8, %v799_v54, -inf  ;;  %v2936_v57 = vpop.f32.mrb[1].mxu1  ;;  %v1861_v58 = vsel %vm1860_vm9, %v3700_v53, -inf }
 0x107   : > { %1862 = vmax.xlane.f32.xlu1 %v1861_v58 }
 0x10c   : > { %v878_v60 = vpop.f32.mrb[2].mxu0 }
 0x10d   : > { %v3707_v61 = vsel %vm1620_vm10, %v878_v60, -inf  ;;  %v2943_v62 = vpop.f32.mrb[3].mxu0 }
 0x10e   : > { %v1867_v63 = vsel %vm1860_vm9, %v3707_v61, -inf }
 0x10f   : > { %1868 = vmax.xlane.f32.xlu1 %v1867_v63 }
 0x111   : > { %v3711_v2 = vpop.f32.mrb[2].mxu1 }
 0x112   : > { %v2952_v3 = vpop.f32.mrb[3].mxu1 }
 0x118   : > { %v1042_v6 = vpop.f32.mrb[4].mxu0 }
 0x119   : > { %v2961_v8 = vpop.f32.mrb[5].mxu0 }
 0x11c   : > { %v1276_v12 = vpop.f32.mrb[6].mxu0 }
 0x11d   : > { %v3718_v13 = vpop.f32.mrb[4].mxu1  ;;  %2994 = vmatmul.mubr.msk.f32.vlgmr.msra.gmra.mrb[10].mxu1 %vm1367_vm11, %v1276_v12  ;;  %v2980_v14 = vpop.f32.mrb[7].mxu0 }
 0x11e   : > { %v2970_v19 = vpop.f32.mrb[5].mxu1  ;;  %3002 = vmatpush3.msk.msra.mxu1 %vm1371_vm5, %v3690_v45  ;;  %3003 = vmatprep.mubr.msk.f32.mxu1 %vm3414_vm0, %v3415_v1 }
 0x11f   : > { %3011 = vmatprep.subr.mxu1 %v3415_v1 }
 0x121   : > { %v1200_v21 = vpop.f32.mrb[6].mxu1  ;;  %3004 = vmatmul.mubr.msk.f32.vlgmr.msra.gmra.mrb[12].mxu1 %vm1367_vm11, %v1628_v16 }
 0x122   : > { %v2975_v23 = vpop.f32.mrb[7].mxu1  ;;  %2989 = vmatmul.mubr.msk.f32.vlgmr.msra.gmra.mrb[8].mxu0 %vm1367_vm11, %v1200_v21  ;;  %3012 = vmatpush3.msk.msra.mxu1 %vm1371_vm5, %v3690_v45 }
 0x123   : > { %2997 = vmatpush3.msk.msra.mxu0 %vm1371_vm5, %v3690_v45  ;;  %2998 = vmatprep.mubr.msk.f32.mxu0 %vm3414_vm0, %v3415_v1 }
 0x124   : > { %3013 = vmatprep.mubr.msk.f32.mxu1 %vm3414_vm0, %v3415_v1  ;;  %3006 = vmatprep.subr.mxu0 %v3415_v1 }
 0x125   : > { %v1352_v27 = vpop.f32.mrb[8].mxu1  ;;  %3014 = vmatmul.mubr.msk.f32.vlgmr.msra.gmra.mrb[14].mxu1 %vm1367_vm11, %v1630_v22  ;;  %3091 = vmatprep.subr.bf16.mxu1 %v3413_v0 }
 0x126   : > { %2999 = vmatmul.mubr.msk.f32.vlgmr.msra.gmra.mrb[10].mxu0 %vm1367_vm11, %v1352_v27  ;;  %v2985_v28 = vpop.f32.mrb[9].mxu1  ;;  %3093 = vmatpush3.bf16.msra.mxu1 %v3612_v24 }
 0x127   : > { %3007 = vmatpush3.msk.msra.mxu0 %vm1371_vm5, %v3690_v45  ;;  %3008 = vmatprep.mubr.msk.f32.mxu0 %vm3414_vm0, %v3415_v1  ;;  %vm3417_vm5 = vmmov 1  }
 0x128   : > { %3088 = vmatprep.subr.bf16.mxu0 %v3413_v0  ;;  %3029 = vmatprep.subr.mxu1 %v3415_v1  ;;  %vm3854_vm6 = vmpackc.low %vm2203_vm4, %vm3417_vm5 }
 0x129   : > { %3031 = vmatprep.mubr.msk.f32.mxu1 %vm3414_vm0, %v3415_v1 }
 0x12a   : > { %3009 = vmatmul.mubr.msk.f32.vlgmr.msra.gmra.mrb[12].mxu0 %vm1367_vm11, %v1629_v31  ;;  %3030 = vmatpush3.msra.mxu1 %v3641_v30 }
 0x12b   : > { %3090 = vmatpush3.bf16.msra.mxu0 %v3594_v17  ;;  %3022 = vmatprep.mubr.msk.f32.mxu0 %vm3414_vm0, %v3415_v1 }
 0x12c   : > { %3020 = vmatprep.subr.mxu0 %v3415_v1  ;;  %3101 = vmatprep.subr.bf16.mxu1 %v3413_v0 }
 0x12f   : > { %3021 = vmatpush3.msra.mxu0 %v3615_v25 }
 0x130   : > { %3094 = vmatprep.subr.bf16.mxu0 %v3413_v0 }
 0x194   : > { %v1863_v24 = vpop.xlane.xlu1 %1862 }
 0x195   : > { %v3758_v32 = vmax.f32 %v1863_v24, -1e+30 }
 0x197   : > { %v1886_v34 = vsub.f32 %v3700_v53, %v3758_v32  ;;  %v1864_v53 = vsel %vm1860_vm9, %v3702_v56, -inf }
 0x199   : > { %v1889_v37 = vmul.f32 1.442695, %v1886_v34 }
 0x19b   : > { %3199 = vpow2.f32 %v1889_v37 }
 0x19c   : > { %v1869_v60 = vpop.xlane.xlu1 %1868 }
 0x19d   : > { %v1872_v62 = vmax.f32 %v1869_v60, -1e+30 }
 0x1a5   : > { %v3770_v58 = vpop.eup %3199 }
 0x1a6   : > { %v1904_v59 = vsel %vm1860_vm9, %v3770_v58, 0.0 }
 0x1f0   : > { %v1514_v30 = vpop.f32.mrb[10].mxu1 }
 0x1f1   : > { %v1592_v35 = vmul.f32 %v1514_v30, %v1042_v6  ;;  %v2995_v17 = vpop.f32.mrb[11].mxu1 }
 0x1f4   : > { %v1700_v38 = vpop.f32.mrb[12].mxu1 }
 0x1f5   : > { %v1441_v39 = vpop.f32.mrb[8].mxu0  ;;  %vm1851_vm12 = vcmp.lt.f32.partialorder %v1850_v36, %v1700_v38  ;;  %v3005_v41 = vpop.f32.mrb[13].mxu1 }
 0x1f6   : > { %v1591_v25 = vmul.f32 %v1441_v39, %v3711_v2  ;;  %v2990_v42 = vpop.f32.mrb[9].mxu0  ;;  %v1888_v2 = vsub.f32 %v3707_v61, %v1872_v62 }
 0x1f8   : > { %v1846_v43 = vpop.f32.mrb[14].mxu1  ;;  %v1857_v45 = vsel %vm1851_vm12, %v1591_v25, -inf  ;;  %v1893_v8 = vmul.f32 1.442695, %v1888_v2 }
 0x1f9   : > { %v1587_v46 = vpop.f32.mrb[10].mxu0  ;;  %vm1853_vm14 = vcmp.lt.f32.partialorder %v1850_v36, %v1846_v43  ;;  %v1874_v47 = vsel %vm1873_vm13, %v1857_v45, -inf  ;;  %v3015_v48 = vpop.f32.mrb[15].mxu1 }
 0x1fa   : > { %v1593_v49 = vmul.f32 %v1587_v46, %v3718_v13  ;;  %1875 = vmax.xlane.f32.xlu0 %v1874_v47  ;;  %v3000_v44 = vpop.f32.mrb[11].mxu0 }
 0x1fc   : > { %v1859_v50 = vsel %vm1853_vm14, %v1593_v49, -inf }
 0x1fd   : > { %v1773_v51 = vpop.f32.mrb[12].mxu0  ;;  %v1880_v52 = vsel %vm1873_vm13, %v1859_v50, -inf }
 0x1fe   : > { %vm1852_vm15 = vcmp.lt.f32.partialorder %v1850_v36, %v1773_v51  ;;  %1881 = vmax.xlane.f32.xlu1 %v1880_v52  ;;  %1865 = vmax.xlane.f32.xlu0 %v1864_v53  ;;  %v3010_v54 = vpop.f32.mrb[13].mxu0 }
 0x1ff   : > { %v1858_v55 = vsel %vm1852_vm15, %v1592_v35, -inf }
 0x200   : > { %v1877_v57 = vsel %vm1873_vm13, %v1858_v55, -inf }
 0x202   : > { %1878 = vmax.xlane.f32.xlu0 %v1877_v57 }
 0x206   : > { %1905 = vadd.xlane.f32.xlu0 %v1904_v59 }
 0x287   : > { %v1876_v63 = vpop.xlane.xlu0 %1875 }
 0x288   : > { %v1883_v3 = vmax.f32 %v1876_v63, -1e+30 }
 0x28a   : > { %v1895_v4 = vsub.f32 %v1857_v45, %v1883_v3  ;;  %v1934_v25 = vmax.f32 %v3758_v32, %v1883_v3 }
 0x28b   : > { %v1882_v5 = vpop.xlane.xlu1 %1881  ;;  %v1866_v6 = vpop.xlane.xlu0 %1865 }
 0x28c   : > { %v1898_v10 = vmul.f32 1.442695, %v1895_v4  ;;  %v1885_v11 = vmax.f32 %v1882_v5, -1e+30  ;;  %v1871_v12 = vmax.f32 %v1866_v6, -1e+30  ;;  %v1937_v42 = vsub.f32 %v3758_v32, %v1934_v25 }
 0x28d   : > { %v1946_v43 = vsub.f32 %v1883_v3, %v1934_v25 }
 0x28e   : > { %3201 = vpow2.f32 %v1898_v10  ;;  %v1897_v13 = vsub.f32 %v1859_v50, %v1885_v11  ;;  %v1887_v14 = vsub.f32 %v3702_v56, %v1871_v12  ;;  %v1940_v45 = vmul.f32 1.442695, %v1937_v42 }
 0x28f   : > { %v1879_v16 = vpop.xlane.xlu0 %1878  ;;  %3203 = vpow2.f32 %v1893_v8  ;;  %v1936_v46 = vmax.f32 %v1872_v62, %v1885_v11  ;;  %v1949_v47 = vmul.f32 1.442695, %v1946_v43 }
 0x290   : > { %v1902_v18 = vmul.f32 1.442695, %v1897_v13  ;;  %v1884_v19 = vmax.f32 %v1879_v16, -1e+30  ;;  %v1891_v20 = vmul.f32 1.442695, %v1887_v14 }
 0x291   : > { %v1939_v48 = vsub.f32 %v1872_v62, %v1936_v46  ;;  %v1948_v49 = vsub.f32 %v1885_v11, %v1936_v46 }
 0x292   : > { %3205 = vpow2.f32 %v1902_v18  ;;  %v1896_v61 = vsub.f32 %v1858_v55, %v1884_v19  ;;  %v1935_v21 = vmax.f32 %v1871_v12, %v1884_v19 }
 0x293   : > { %3207 = vpow2.f32 %v1891_v20  ;;  %v1906_v22 = vpop.xlane.xlu0 %1905  ;;  %v1944_v44 = vmul.f32 1.442695, %v1939_v48  ;;  %v1953_v50 = vmul.f32 1.442695, %v1948_v49 }
 0x294   : > { %v1900_v23 = vmul.f32 1.442695, %v1896_v61  ;;  %v1938_v26 = vsub.f32 %v1871_v12, %v1935_v21  ;;  %v1947_v27 = vsub.f32 %v1884_v19, %v1935_v21  ;;  %3209 = vrcp.f32 %v1906_v22 }
 0x296   : > { %3211 = vpow2.f32 %v1900_v23  ;;  %v1942_v51 = vmul.f32 1.442695, %v1938_v26  ;;  %v1951_v52 = vmul.f32 1.442695, %v1947_v27 }
 0x297   : > { %3213 = vpow2.f32 %v1940_v45 }
 0x298   : > { %v3776_v28 = vpop.eup %3201  ;;  %3215 = vpow2.f32 %v1949_v47 }
 0x299   : > { %v1913_v56 = vsel %vm1873_vm13, %v3776_v28, 0.0  ;;  %v3783_v31 = vpop.eup %3203  ;;  %3217 = vpow2.f32 %v1944_v44 }
 0x29a   : > { %1914 = vadd.xlane.f32.xlu1 %v1913_v56  ;;  %v1910_v30 = vsel %vm1860_vm9, %v3783_v31, 0.0  ;;  %3219 = vpow2.f32 %v1953_v50 }
 0x29b   : > { %3221 = vpow2.f32 %v1942_v51 }
 0x29c   : > { %v3788_v24 = vpop.eup %3205  ;;  %3223 = vpow2.f32 %v1951_v52 }
 0x29d   : > { %v3790_v34 = vpop.eup %3207  ;;  %v1919_v39 = vsel %vm1873_vm13, %v3788_v24, 0.0 }
 0x29e   : > { %v3210_v35 = vpop.eup %3209  ;;  %1911 = vadd.xlane.f32.xlu1 %v1910_v30  ;;  %v1907_v17 = vsel %vm1860_vm9, %v3790_v34, 0.0 }
 0x29f   : > { %v1925_v36 = vmul.f32 %v3210_v35, %v3770_v58  ;;  %1908 = vadd.xlane.f32.xlu0 %v1907_v17 }
 0x2a0   : > { %v3797_v37 = vpop.eup %3211 }
 0x2a1   : > { %v2430_v38 = vsel %vm2199_vm1, %v1925_v36, 0.0  ;;  %v1916_v41 = vsel %vm1873_vm13, %v3797_v37, 0.0  ;;  %v3214_v53 = vpop.eup %3213 }
 0x2a2   : > { %1920 = vadd.xlane.f32.xlu1 %v1919_v39  ;;  %2433 = vst [vmem:[%s3805_s24] sm:$0x1] %v2430_v38  ;;  %v3216_v54 = vpop.eup %3215  ;;  %v1955_v32 = vmul.f32 %v3214_v53, %v1906_v22 }
 0x2a3   : > { %1917 = vadd.xlane.f32.xlu0 %v1916_v41  ;;  %v3218_v63 = vpop.eup %3217 }
 0x2a4   : > { %v3220_v2 = vpop.eup %3219 }
 0x2a5   : > { %v3222_v3 = vpop.eup %3221 }
 0x2a6   : > { %v3224_v5 = vpop.eup %3223 }
 0x327   : > { %v1915_v55 = vpop.xlane.xlu1 %1914 }
 0x328   : > { %3225 = vrcp.f32 %v1915_v55  ;;  %v1958_v57 = vmul.f32 %v3216_v54, %v1915_v55 }
 0x32a   : > { %v1961_v59 = vadd.f32 %v1958_v57, %v1955_v32 }
 0x32b   : > { %v1912_v60 = vpop.xlane.xlu1 %1911 }
 0x32c   : > { %3227 = vrcp.f32 %v1961_v59  ;;  %v1909_v62 = vpop.xlane.xlu0 %1908  ;;  %v1957_v6 = vmul.f32 %v3218_v63, %v1912_v60 }
 0x32d   : > { %3229 = vrcp.f32 %v1912_v60  ;;  %v1956_v11 = vmul.f32 %v3222_v3, %v1909_v62 }
 0x32e   : > { %3231 = vrcp.f32 %v1909_v62 }
 0x32f   : > { %v1921_v4 = vpop.xlane.xlu1 %1920 }
 0x330   : > { %3233 = vrcp.f32 %v1921_v4  ;;  %v1960_v8 = vmul.f32 %v3220_v2, %v1921_v4  ;;  %v1918_v10 = vpop.xlane.xlu0 %1917 }
 0x331   : > { %3235 = vrcp.f32 %v1918_v10  ;;  %v1959_v12 = vmul.f32 %v3224_v5, %v1918_v10 }
 0x332   : > { %v3226_v13 = vpop.eup %3225  ;;  %v1963_v14 = vadd.f32 %v1960_v8, %v1957_v6 }
 0x333   : > { %v1931_v16 = vmul.f32 %v3226_v13, %v3776_v28  ;;  %v1962_v18 = vadd.f32 %v1959_v12, %v1956_v11 }
 0x334   : > { %3237 = vrcp.f32 %v1963_v14 }
 0x335   : > { %v2436_v19 = vsel %vm1979_vm2, %v1931_v16, 0.0  ;;  %3239 = vrcp.f32 %v1962_v18 }
 0x336   : > { %v3228_v20 = vpop.eup %3227  ;;  %2439 = vst [vmem:[%s3814_s28] sm:$0x1] %v2436_v19 }
 0x337   : > { %v3230_v61 = vpop.eup %3229  ;;  %v1973_v21 = vmul.f32 %v3228_v20, %v3216_v54  ;;  %v1967_v22 = vmul.f32 %v3228_v20, %v3214_v53 }
 0x338   : > { %v3232_v23 = vpop.eup %3231  ;;  %v1927_v26 = vmul.f32 %v3230_v61, %v3783_v31 }
 0x339   : > { %v1926_v56 = vmul.f32 %v3232_v23, %v3790_v34  ;;  %v1976_v30 = vmul.f32 %v3776_v28, %v1973_v21  ;;  %v1970_v35 = vmul.f32 %v3770_v58, %v1967_v22 }
 0x33a   : > { %v3234_v17 = vpop.eup %3233  ;;  %v2432_v36 = vsel %vm2199_vm1, %v1927_v26, 0.0 }
 0x33b   : > { %v3236_v38 = vpop.eup %3235  ;;  %v2431_v39 = vsel %vm2199_vm1, %v1926_v56, 0.0  ;;  %v1933_v41 = vmul.f32 %v3234_v17, %v3788_v24  ;;  %3023 = vmatmul.mubr.msk.f32.vlgmr.msra.gmra.mrb[14].mxu0 %vm1979_vm2, %v1976_v30  ;;  %v2452_v40 = vsel %vm1979_vm2, %v1976_v30, 0.0  ;;  %v2442_v25 = vsel %vm2199_vm1, %v1970_v35, 0.0  ;;  %2435 = vst [vmem:[%s3805_s24 + $0x2] sm:$0x1] %v2432_v36 }
 0x33c   : > { %v1932_v28 = vmul.f32 %v3236_v38, %v3797_v37  ;;  %3096 = vmatpush3.bf16.msra.mxu0 %v3631_v29  ;;  %3040 = vmatprep.mubr.msk.f32.mxu0 %vm3414_vm0, %v3415_v1  ;;  %2434 = vst [vmem:[%s3805_s24 + $0x1] sm:$0x1] %v2431_v39  ;;  %2449 = vst.msk [vmem:[%s3838_s16] sm:$0x1] %vm3819_vm3, %v2442_v25  ;;  %s3241_s24 = scalar_lea.vmem %s3910_s26, 96 }
 0x33d   : > { %2455 = vst.msk [vmem:[%s3838_s16 + $0x1] sm:$0x1] %vm3819_vm3, %v2452_v40  ;;  %v2438_v58 = vsel %vm1979_vm2, %v1933_v41, 0.0  ;;  %3038 = vmatprep.subr.mxu0 %v3415_v1  ;;  %p3242_p12 = scmp.ne.s32.totalorder %s3910_s26, %s3241_s24 }
 0x33e   : > { %v3238_v42 = vpop.eup %3237  ;;  %v2437_v29 = vsel %vm1979_vm2, %v1932_v28, 0.0  ;;  %2441 = vst [vmem:[%s3814_s28 + $0x2] sm:$0x1] %v2438_v58 }
 0x33f   : > { %v3240_v43 = vpop.eup %3239  ;;  %v1975_v45 = vmul.f32 %v3238_v42, %v3220_v2  ;;  %v1969_v46 = vmul.f32 %v3238_v42, %v3218_v63  ;;  %2440 = vst [vmem:[%s3814_s28 + $0x1] sm:$0x1] %v2437_v29  ;;  %p3243_p13 = pnand %p3242_p12, %p3528_p4 }
 0x340   : > { %3039 = vmatpush3.msra.mxu0 %v3657_v33  ;;  %v1974_v47 = vmul.f32 %v3240_v43, %v3224_v5  ;;  %v1968_v48 = vmul.f32 %v3240_v43, %v3222_v3 }
 0x341   : > { %v1978_v49 = vmul.f32 %v3788_v24, %v1975_v45  ;;  %3097 = vmatprep.subr.bf16.mxu0 %v3413_v0  ;;  %v1972_v50 = vmul.f32 %v3783_v31, %v1969_v46  ;;  %p3244_p0 = pneg %p3243_p13 }
 0x342   : > { %v1977_v51 = vmul.f32 %v3797_v37, %v1974_v47  ;;  %v1971_v33 = vmul.f32 %v3790_v34, %v1968_v48 }
 0x343   : > { %3041 = vmatmul.mubr.msk.f32.vlgmr.msra.gmra.mrb[16].mxu0 %vm1979_vm2, %v1978_v49  ;;  %v2454_v52 = vsel %vm1979_vm2, %v1978_v49, 0.0  ;;  %v2444_v24 = vsel %vm2199_vm1, %v1972_v50, 0.0 }
 0x344   : > { %3032 = vmatmul.mubr.msk.f32.vlgmr.msra.gmra.mrb[16].mxu1 %vm1979_vm2, %v1977_v51  ;;  %v2453_v53 = vsel %vm1979_vm2, %v1977_v51, 0.0  ;;  %3100 = vmatpush3.bf16.msk.msra.mxu0 %vm3854_vm6, %v3565_v7  ;;  %v2443_v31 = vsel %vm2199_vm1, %v1971_v33, 0.0  ;;  %2451 = vst.msk [vmem:[%s3838_s16 + $0x4] sm:$0x1] %vm3819_vm3, %v2444_v24  ;;  %2457 = vst.msk [vmem:[%s3838_s16 + $0x5] sm:$0x1] %vm3819_vm3, %v2454_v52 }
 0x345   : > { %3104 = vmatpush3.bf16.msk.msra.mxu1 %vm3854_vm6, %v3567_v9  ;;  %3047 = vmatprep.mubr.msk.f32.mxu0 %vm3414_vm0, %v3415_v1  ;;  %2450 = vst.msk [vmem:[%s3838_s16 + $0x2] sm:$0x1] %vm3819_vm3, %v2443_v31  ;;  %2456 = vst.msk [vmem:[%s3838_s16 + $0x3] sm:$0x1] %vm3819_vm3, %v2453_v53  ;;  %s3245_s16 = sshll.u32 %s3418_s13, 4  ;;  %s3246_s16 = int_to_ptr.vmem [resolvable:$false] %s3245_s16 }
 0x346   : > { %3105 = vmatprep.subr.bf16.mxu0 %v3413_v0  ;;  %3054 = vmatprep.mubr.msk.f32.mxu1 %vm3414_vm0, %v3415_v1  ;;  %s3247_s5 = scalar_lea.vmem %s3246_s16, 192  ;;  %p3248_p1 = scmp.lt.s32.totalorder %s3910_s26, %s3246_s16 }
 0x347   : > { %3048 = vmatmul.mubr.msk.f32.vlgmr.msra.gmra.mrb[14].mxu0 %vm2199_vm1, %v1970_v35  ;;  %p3249_p2 = scmp.lt.s32.totalorder %s3247_s5, %s3241_s24 }
 0x348   : > { %3108 = vmatpush3.bf16.msk.msra.mxu0 %vm3854_vm6, %v3592_v15  ;;  %3061 = vmatprep.mubr.msk.f32.mxu0 %vm3414_vm0, %v3415_v1 }
 0x349   : > { %p3250_p3 = por %p3249_p2, %p3248_p1 }
 0x34b   : > { %3062 = vmatmul.mubr.msk.f32.vlgmr.msra.gmra.mrb[16].mxu0 %vm2199_vm1, %v1972_v50  ;;  %p3251_p5 = pnand %p3250_p3, %p3244_p0 }
 0x34c   : > { %3055 = vmatmul.mubr.msk.f32.vlgmr.msra.gmra.mrb[16].mxu1 %vm2199_vm1, %v1971_v33 }
 0x34d   : > { %3254 = shalt.err (!%p3251_p5)
}
 0x34e   : > { %s3255_s1 = scalar_lea.hbm %s3908_s3, 96  ;;  %s3259_s13 = scalar_lea.hbm %s4109_s9, 192 }
 0x34f   : > { %p3256_p6 = scmp.ne.s32.totalorder %s3908_s3, %s3255_s1  ;;  %p3260_p10 = scmp.lt.u32.totalorder %s3908_s3, %s4109_s9 }
 0x350   : > { %p3261_p11 = scmp.lt.u32.totalorder %s3259_s13, %s3255_s1  ;;  %p3263_p13 = scmp.lt.u32.totalorder %s3255_s1, %s3908_s3 }
 0x351   : > { %p3257_p7 = pnand %p3256_p6, %p3528_p4 }
 0x352   : > { %p3262_p12 = por %p3261_p11, %p3260_p10 }
 0x353   : > { %p3258_p9 = pneg %p3257_p7 }
 0x354   : > { %p3264_p0 = por %p3263_p13, %p3262_p12 }
 0x356   : > { %p3265_p1 = pnand %p3264_p0, %p3258_p9 }
 0x358   : > { %3268 = shalt.err (!%p3265_p1)
}
 0x359   : > { %s3419_s5 = smov 32   ;;  %s3420_s24 = smov 2  }
 0x35a   : > { %s4110_s4 = scalar_lea.sflag [#allocation5], %s3902_s15  ;;  %s3939_s2 = smul.u32 48, %s3403_s20 }
 0x35b   : > { %3119 = dma.vmem_to_hbm [thread:$0]  (%p3528_p4), %s3910_s26, 96, %s3908_s3, %s4110_s4, %s3419_s5, %s3419_s5, %s3420_s24  }
 0x35c   : > { %s3945_s13 = scalar_lea.hbm %s4079_s10, %s3939_s2  ;;  %s3269_s16 = scalar_lea.vmem %s3912_s14, 48 }
 0x35d   : > { %p3270_p2 = scmp.ne.s32.totalorder %s3912_s14, %s3269_s16  ;;  %s3421_s6 = smov [#allocation6]  }
 0x35e   : > { %s3273_s7 = sshll.u32 %s3421_s6, 4  ;;  %s3274_s7 = int_to_ptr.vmem [resolvable:$false] %s3273_s7 }
 0x35f   : > { %p3271_p3 = pnand %p3270_p2, %p3528_p4  ;;  %s3275_s9 = scalar_lea.vmem %s3274_s7, 96 }
 0x360   : > { %p3276_p6 = scmp.lt.s32.totalorder %s3912_s14, %s3274_s7  ;;  %p3277_p7 = scmp.lt.s32.totalorder %s3275_s9, %s3269_s16 }
 0x361   : > { %p3272_p5 = pneg %p3271_p3 }
 0x362   : > { %p3278_p9 = por %p3277_p7, %p3276_p6 }
 0x364   : > { %p3279_p10 = pnand %p3278_p9, %p3272_p5 }
 0x366   : > { %3282 = shalt.err (!%p3279_p10)
}
 0x367   : > { %s3283_s3 = scalar_lea.hbm %s3945_s13, 48  ;;  %s3287_s6 = scalar_lea.hbm %s4079_s10, 96 }
 0x368   : > { %p3284_p11 = scmp.ne.s32.totalorder %s3945_s13, %s3283_s3  ;;  %p3288_p0 = scmp.lt.u32.totalorder %s3945_s13, %s4079_s10 }
 0x369   : > { %p3289_p1 = scmp.lt.u32.totalorder %s3287_s6, %s3283_s3  ;;  %p3291_p3 = scmp.lt.u32.totalorder %s3283_s3, %s3945_s13 }
 0x36a   : > { %p3285_p12 = pnand %p3284_p11, %p3528_p4 }
 0x36b   : > { %p3290_p2 = por %p3289_p1, %p3288_p0 }
 0x36c   : > { %p3286_p13 = pneg %p3285_p12 }
 0x36d   : > { %p3292_p5 = por %p3291_p3, %p3290_p2 }
 0x36f   : > { %p3293_p6 = pnand %p3292_p5, %p3286_p13 }
 0x371   : > { %3296 = shalt.err (!%p3293_p6)
}
 0x372   : > { %s3422_s9 = smov 16   ;;  %s3423_s24 = smov 1  }
 0x373   : > { %3120 = dma.vmem_to_hbm [thread:$0]  (%p3528_p4), %s3912_s14, 48, %s3945_s13, %s4110_s4, %s3422_s9, %s3422_s9, %s3423_s24  }
 0x374   : > { %s3977_s16 = scalar_lea.hbm %s4080_s11, %s3939_s2  ;;  %s2541_s3 = sshll.u32 %s3814_s28, 4  ;;  %s3980_s3 = int_to_ptr.vmem [resolvable:$true] %s2541_s3 }
 0x375   : > { %s2474_s20 = scalar_lea.sflag [#allocation8], %s3779_s12  ;;  %s3297_s26 = scalar_lea.vmem %s3980_s3, 48 }
 0x376   : > { %p3298_p7 = scmp.ne.s32.totalorder %s3980_s3, %s3297_s26  ;;  %s3424_s6 = smov [#allocation7]  }
 0x377   : > { %s3301_s15 = sshll.u32 %s3424_s6, 4  ;;  %s3302_s15 = int_to_ptr.vmem [resolvable:$false] %s3301_s15 }
 0x378   : > { %p3299_p9 = pnand %p3298_p7, %p3528_p4  ;;  %s3303_s14 = scalar_lea.vmem %s3302_s15, 96 }
 0x379   : > { %p3304_p11 = scmp.lt.s32.totalorder %s3980_s3, %s3302_s15  ;;  %p3305_p12 = scmp.lt.s32.totalorder %s3303_s14, %s3297_s26 }
 0x37a   : > { %p3300_p10 = pneg %p3299_p9 }
 0x37b   : > { %p3306_p13 = por %p3305_p12, %p3304_p11 }
 0x37d   : > { %p3307_p0 = pnand %p3306_p13, %p3300_p10 }
 0x37f   : > { %3310 = shalt.err (!%p3307_p0)
}
 0x380   : > { %s3311_s28 = scalar_lea.hbm %s3977_s16, 48  ;;  %s3315_s7 = scalar_lea.hbm %s4080_s11, 96 }
 0x381   : > { %p3312_p1 = scmp.ne.s32.totalorder %s3977_s16, %s3311_s28  ;;  %p3316_p5 = scmp.lt.u32.totalorder %s3977_s16, %s4080_s11 }
 0x382   : > { %p3317_p6 = scmp.lt.u32.totalorder %s3315_s7, %s3311_s28  ;;  %p3319_p9 = scmp.lt.u32.totalorder %s3311_s28, %s3977_s16 }
 0x383   : > { %p3313_p2 = pnand %p3312_p1, %p3528_p4 }
 0x384   : > { %p3318_p7 = por %p3317_p6, %p3316_p5 }
 0x385   : > { %p3314_p3 = pneg %p3313_p2 }
 0x386   : > { %p3320_p10 = por %p3319_p9, %p3318_p7 }
 0x388   : > { %p3321_p11 = pnand %p3320_p10, %p3314_p3 }
 0x38a   : > { %3324 = shalt.err (!%p3321_p11)
}
 0x38b   : > { %3121 = dma.vmem_to_hbm [thread:$0]  (%p3528_p4), %s3980_s3, 48, %s3977_s16, %s2474_s20, %s3422_s9, %s3422_s9, %s3423_s24   ;;  %vm2426_vm0 = vcmask 253952  }
 0x38c   : > { %s537_s0 = scalar_lea.vmem [#allocation2], %s3786_s23  ;;  %s4016_s14 = scalar_lea.hbm %s4077_s8, %s3939_s2 }
 0x38d   : > { %s2488_s26 = sshll.u32 %s537_s0, 4  ;;  %s2459_s23 = scalar_lea.sflag [#allocation3], %s3779_s12  ;;  %s4010_s26 = int_to_ptr.vmem [resolvable:$true] %s2488_s26 }
 0x38e   : > { %s3325_s16 = scalar_lea.vmem %s4010_s26, 48  ;;  %s3425_s3 = smov [#allocation2]  }
 0x38f   : > { %p3326_p12 = scmp.ne.s32.totalorder %s4010_s26, %s3325_s16  ;;  %s3329_s20 = sshll.u32 %s3425_s3, 4  ;;  %s3330_s20 = int_to_ptr.vmem [resolvable:$false] %s3329_s20 }
 0x390   : > { %s3331_s28 = scalar_lea.vmem %s3330_s20, 96  ;;  %p3332_p1 = scmp.lt.s32.totalorder %s4010_s26, %s3330_s20 }
 0x391   : > { %p3327_p13 = pnand %p3326_p12, %p3528_p4  ;;  %p3333_p2 = scmp.lt.s32.totalorder %s3331_s28, %s3325_s16 }
 0x393   : > { %p3328_p0 = pneg %p3327_p13  ;;  %p3334_p3 = por %p3333_p2, %p3332_p1 }
 0x395   : > { %p3335_p5 = pnand %p3334_p3, %p3328_p0 }
 0x41a   : > { %v2272_v0 = vpop.f32.mrb[14].mxu0 }
 0x41b   : > { %2427 = vst.msk [vmem:[%s537_s0] sm:$0x1] %vm2426_vm0, %v2272_v0  ;;  %v3049_v1 = vpop.f32.mrb[15].mxu0 }
 0x41e   : > { %v2422_v7 = vpop.f32.mrb[16].mxu0 }
 0x41f   : > { %v2347_v9 = vpop.f32.mrb[16].mxu1  ;;  %2429 = vst.msk [vmem:[%s537_s0 + $0x2] sm:$0x1] %vm2426_vm0, %v2422_v7  ;;  %v3063_v15 = vpop.f32.mrb[17].mxu0 }
 0x420   : > { %2428 = vst.msk [vmem:[%s537_s0 + $0x1] sm:$0x1] %vm2426_vm0, %v2347_v9  ;;  %v3056_v34 = vpop.f32.mrb[17].mxu1 }
 0x421   : > { %3338 = shalt.err (!%p3335_p5)
}
 0x422   : > { %s3339_s2 = scalar_lea.hbm %s4016_s14, 48  ;;  %s3343_s7 = scalar_lea.hbm %s4077_s8, 96 }
 0x423   : > { %p3340_p6 = scmp.ne.s32.totalorder %s4016_s14, %s3339_s2  ;;  %p3344_p10 = scmp.lt.u32.totalorder %s4016_s14, %s4077_s8 }
 0x424   : > { %p3345_p11 = scmp.lt.u32.totalorder %s3343_s7, %s3339_s2  ;;  %p3347_p13 = scmp.lt.u32.totalorder %s3339_s2, %s4016_s14 }
 0x425   : > { %p3341_p7 = pnand %p3340_p6, %p3528_p4 }
 0x426   : > { %p3346_p12 = por %p3345_p11, %p3344_p10 }
 0x427   : > { %p3342_p9 = pneg %p3341_p7 }
 0x428   : > { %p3348_p0 = por %p3347_p13, %p3346_p12 }
 0x42a   : > { %p3349_p1 = pnand %p3348_p0, %p3342_p9 }
 0x42c   : > { %3352 = shalt.err (!%p3349_p1)
}
 0x42d   : > { %3118 = dma.vmem_to_hbm [thread:$0]  (%p3528_p4), %s4010_s26, 48, %s4016_s14, %s2459_s23, %s3422_s9, %s3422_s9, %s3423_s24  }
 0x42e PF: > { %p3139_p2 = scmp.ge.s32.totalorder %s3411_s22, 2  ;;  %s2556_s0 = sand.u32 1, %s3391_s17  }
 0x42f   : > { %s2557_s6 = scalar_lea.sflag [#allocation3], %s2556_s0 }
 0x430   : > { %p3127_p3 = pnand %p3139_p2, %p3537_p8 }
 0x432   : > { %3378 = dma.done.wait (!%p3127_p3), %s2557_s6, 48  }
 0x433   : > { %3380 = vsyncadd (!%p3127_p3), %s2557_s6, 4294967248  ;;  %s4111_s27 = sadd.s32 4294967294, %s3411_s22  }
 0x434   : > { %s2565_s15 = sand.u32 1, %s4111_s27  }
 0x435   : > { %s2566_s16 = scalar_lea.sflag [#allocation5], %s2565_s15 }
 0x436   : > { %3382 = dma.done.wait (!%p3127_p3), %s2566_s16, 144  }
 0x437   : > { %3384 = vsyncadd (!%p3127_p3), %s2566_s16, 4294967152  ;;  %s2584_s12 = scalar_lea.sflag [#allocation8], %s2556_s0 }
 0x438   : > { %3386 = dma.done.wait (!%p3127_p3), %s2584_s12, 48  }
 0x439   : > { %3388 = vsyncadd (!%p3127_p3), %s2584_s12, 4294967248  ;;  %s31_s22 = sadd.s32 1, %s3411_s22   ;;  %s4112_s17 = smov %s3395_s18 }
 0x43a   : > { %p28_p4 = scmp.ge.s32.totalorder %s31_s22, 4   ;;  %s4113_s18 = smov %s3399_s19 }
 0x43b   : > { %s4114_s19 = smov %s3543_s30  ;;  %s4115_s20 = smov %s3407_s21 }
 0x43c   : > { %s4116_s21 = smov %s4118_s25  ;;  %30 = sbr.rel (!%p28_p4) target bundleno = 18 (0x12), region = 157 }
 0x443   :  { %2589 = vsyncpa [#allocation3], 1 }
 0x444   :  { %2591 = vsyncpa [#allocation3 + $0x1], 1 }
 0x445   :  { %2592 = vsyncpa [#allocation5], 1 }
 0x446   :  { %2594 = vsyncpa [#allocation5 + $0x1], 1 }
 0x447   :  { %2595 = vsyncpa [#allocation8], 1 }
 0x448   :  { %2597 = vsyncpa [#allocation8 + $0x1], 1 }

</bundles_post_ra>
